<compile_context>
chip_gen: v7x
topology: tpu7x:2x2x1
jax: 0.10.0
libtpu: 0.0.40
codegen_flags: <defaults>
</compile_context>

<pallas_src>
import jax
import jax.numpy as jnp
from jax import lax
from jax.experimental import pallas as pl
from jax.experimental.pallas import tpu as pltpu

IN_FEATURES = 512
OUT_FEATURES = 2048
TN = 512          # output-feature tile -> grid of 4 (>= 2 steps per v7x TC)


def linear_gelu_kernel(x_ref, w_ref, b_ref, o_ref):
    # x_ref: (M, K) resident; w_ref: (1, K, TN) weight slab; b_ref: (1, TN); o_ref: (M, TN)
    acc = jnp.dot(x_ref[...], w_ref[0], preferred_element_type=jnp.float32)
    acc = acc + b_ref[...]                      # broadcast bias over rows
    # exact (erf-based) GELU, matching torch.nn.GELU(approximate='none')
    inv_sqrt2 = jnp.float32(0.7071067811865476)
    out = 0.5 * acc * (1.0 + lax.erf(acc * inv_sqrt2))
    o_ref[...] = out.astype(o_ref.dtype)


def linear_gelu(x, weight_blocked, bias):
    """x: (..., K) f32, weight_blocked: (N//TN, K, TN) pre-blocked, bias: (N,). -> (..., N)."""
    orig_shape = x.shape
    K = orig_shape[-1]
    nb, _, tn = weight_blocked.shape
    N = nb * tn

    xm = x.reshape(-1, K)                       # (M, K); no padding / slicing
    M = xm.shape[0]
    b2 = bias.reshape(1, N)                     # (1, N)

    cost = pl.CostEstimate(
        flops=2 * M * K * N,
        transcendentals=0,                      # erf -> VPU polynomial, not EUP
        bytes_accessed=4 * (M * K + K * N + N + M * N),
    )

    out = pl.pallas_call(
        linear_gelu_kernel,
        out_shape=jax.ShapeDtypeStruct((M, N), x.dtype),
        grid_spec=pltpu.PrefetchScalarGridSpec(
            num_scalar_prefetch=0,
            grid=(nb,),
            in_specs=[
                pl.BlockSpec((M, K), lambda j: (0, 0)),       # activations resident
                pl.BlockSpec((1, K, tn), lambda j: (j, 0, 0)),  # contiguous weight slab
                pl.BlockSpec((1, tn), lambda j: (0, j)),      # bias tile
            ],
            out_specs=pl.BlockSpec((M, tn), lambda j: (0, j)),
        ),
        compiler_params=pltpu.CompilerParams(
            dimension_semantics=("parallel",),
        ),
        cost_estimate=cost,
    )(xm, weight_blocked, b2)

    return out.reshape(*orig_shape[:-1], N)


if __name__ == "__main__":
    key = jax.random.PRNGKey(0)
    kx, kw, kb = jax.random.split(key, 3)

    # input consistent with the module's forward: (1, 14, 14, 512)
    x = jax.random.normal(kx, (1, 14, 14, IN_FEATURES), dtype=jnp.float32)

    # deterministic parameter init (same shapes as nn.Linear(512, 2048))
    bound = 1.0 / jnp.sqrt(jnp.float32(IN_FEATURES))
    weight = jax.random.uniform(
        kw, (OUT_FEATURES, IN_FEATURES), dtype=jnp.float32, minval=-bound, maxval=bound
    )
    bias = jax.random.uniform(
        kb, (OUT_FEATURES,), dtype=jnp.float32, minval=-bound, maxval=bound
    )

    # pre-transpose + pre-block once at parameter-setup time (static weight)
    # (K, N) -> (N//TN, K, TN), block j == weight.T[:, j*TN:(j+1)*TN]
    weight_t = jnp.asarray(weight.T)                              # (K, N)
    weight_blocked = weight_t.reshape(
        IN_FEATURES, OUT_FEATURES // TN, TN
    ).transpose(1, 0, 2)                                          # (N//TN, K, TN)
    weight_blocked = jnp.asarray(weight_blocked)

    y = linear_gelu(x, weight_blocked, bias)
    jax.block_until_ready(y)

    # lightweight correctness check against pure-JAX reference
    pre = x @ weight.T + bias
    ref = 0.5 * pre * (1.0 + lax.erf(pre / jnp.sqrt(2.0)))
    assert y.shape == (1, 14, 14, OUT_FEATURES)
    assert jnp.allclose(y, ref, atol=1e-5, rtol=1e-5)

    print("KERNEL_OK")
</pallas_src>

<mosaic_0001>
module attributes {stable_mosaic.version = 11 : i64} {
  func.func @linear_gelu_kernel(%arg0: i32, %arg1: memref<196x512xf32, #tpu.memory_space<vmem>>, %arg2: memref<1x512x512xf32, #tpu.memory_space<vmem>>, %arg3: memref<1x512xf32, #tpu.memory_space<vmem>>, %arg4: memref<196x512xf32, #tpu.memory_space<vmem>>) attributes {dimension_semantics = [#tpu.dimension_semantics<parallel>], iteration_bounds = array<i64: 4>, scalar_prefetch = 0 : i64, scratch_operands = 0 : i64, tpu.core_type = #tpu.core_type<tc>, window_params = [{pipeline_mode = #tpu.pipeline_mode<synchronous>, transform_indices = @transform_0, window_bounds = array<i64: 196, 512>}, {transform_indices = @transform_1, window_bounds = array<i64: 1, 512, 512>}, {transform_indices = @transform_2, window_bounds = array<i64: 1, 512>}, {transform_indices = @transform_3, window_bounds = array<i64: 196, 512>}]} {
    %c0 = arith.constant 0 : index
    %c0_0 = arith.constant 0 : index
    %0 = vector.load %arg1[%c0, %c0_0] : memref<196x512xf32, #tpu.memory_space<vmem>>, vector<196x512xf32>
    %c0_1 = arith.constant 0 : index
    %c0_2 = arith.constant 0 : index
    %c0_3 = arith.constant 0 : index
    %1 = vector.load %arg2[%c0_1, %c0_2, %c0_3] : memref<1x512x512xf32, #tpu.memory_space<vmem>>, vector<1x512x512xf32>
    %2 = vector.shape_cast %1 : vector<1x512x512xf32> to vector<512x512xf32>
    %cst = arith.constant dense<0.000000e+00> : vector<196x512xf32>
    %3 = tpu.matmul %0, %2, %cst {dimension_numbers = #tpu.dot_dimension_numbers<[1], [0], [0], [1], [0, 0, 1, 1], [], []>} : vector<196x512xf32>, vector<512x512xf32>, vector<196x512xf32> -> vector<196x512xf32>
    %c0_4 = arith.constant 0 : index
    %c0_5 = arith.constant 0 : index
    %4 = vector.load %arg3[%c0_4, %c0_5] : memref<1x512xf32, #tpu.memory_space<vmem>>, vector<1x512xf32>
    %5 = vector.broadcast %4 : vector<1x512xf32> to vector<196x512xf32>
    %6 = arith.addf %3, %5 : vector<196x512xf32>
    %cst_6 = arith.constant 5.000000e-01 : f32
    %7 = vector.broadcast %cst_6 : f32 to vector<196x512xf32>
    %8 = arith.mulf %7, %6 : vector<196x512xf32>
    %cst_7 = arith.constant 0.707106769 : f32
    %9 = vector.broadcast %cst_7 : f32 to vector<196x512xf32>
    %10 = arith.mulf %6, %9 : vector<196x512xf32>
    %11 = math.erf %10 : vector<196x512xf32>
    %cst_8 = arith.constant 1.000000e+00 : f32
    %12 = vector.broadcast %cst_8 : f32 to vector<196x512xf32>
    %13 = arith.addf %12, %11 : vector<196x512xf32>
    %14 = arith.mulf %8, %13 : vector<196x512xf32>
    %c0_9 = arith.constant 0 : index
    %c0_10 = arith.constant 0 : index
    %15 = vector.load %arg4[%c0_9, %c0_10] : memref<196x512xf32, #tpu.memory_space<vmem>>, vector<196x512xf32>
    tpu.vector_store %arg4[%c0_9, %c0_10], %14 {strides = array<i32>} : memref<196x512xf32, #tpu.memory_space<vmem>>, vector<196x512xf32>,
    return
  }
  func.func @transform_0(%arg0: i32) -> (i32, i32) {
    %c0_i32 = arith.constant 0 : i32
    %c0_i32_0 = arith.constant 0 : i32
    %c0_i32_1 = arith.constant 0 : i32
    return %c0_i32, %c0_i32_0 : i32, i32
  }
  func.func @transform_1(%arg0: i32) -> (i32, i32, i32) {
    %c0_i32 = arith.constant 0 : i32
    %c0_i32_0 = arith.constant 0 : i32
    %c0_i32_1 = arith.constant 0 : i32
    return %arg0, %c0_i32, %c0_i32_0 : i32, i32, i32
  }
  func.func @transform_2(%arg0: i32) -> (i32, i32) {
    %c0_i32 = arith.constant 0 : i32
    %c0_i32_0 = arith.constant 0 : i32
    return %c0_i32, %arg0 : i32, i32
  }
  func.func @transform_3(%arg0: i32) -> (i32, i32) {
    %c0_i32 = arith.constant 0 : i32
    %c0_i32_0 = arith.constant 0 : i32
    return %c0_i32, %arg0 : i32, i32
  }
}

</mosaic_0001>

<bundles_post_ra>
// kernel: tpu_custom_call.1
= control target key start
LH: loop header
LB: loop body
LE: loop exit
PB: predicated region body
PF: predicated region fallthrough
CT: control target
= control target key end

     0   :  { %8 = vsyncpa [#allocation3], 0  ;;  %s4425_s0 = inlined_call_operand.hbm [shape: f32[196,512], index: 0, kind: input, shape index: {}]   ;;  %s4426_s1 = inlined_call_operand.hbm [shape: f32[4,512,512], index: 1, kind: input, shape index: {}]   ;;  %s4427_s2 = inlined_call_operand.hbm [shape: f32[1,2048], index: 2, kind: input, shape index: {}]   ;;  %s4428_s3 = inlined_call_operand.hbm [shape: f32[196,2048], index: 3, kind: output, shape index: {}]  }
   0x1   :  { %9 = vsyncpa [#allocation6], 0 }
   0x2   :  { %11 = vsyncpa [#allocation6 + $0x1], 0 }
   0x3   :  { %12 = vsyncpa [#allocation4], 0 }
   0x4   :  { %14 = vsyncpa [#allocation4 + $0x1], 0  ;;  %s3132_s12 = smov 0   ;;  %s3134_s13 = smov 0  }
   0x5   :  { %s3136_s14 = smov 0   ;;  %s3138_s15 = smov 0  }
   0x6 LB: > { %s3153_s16 = sadd.s32 1, %s3101_s15   ;;  %s48_s17 = sadd.s32 1, %s3097_s14  ;;  %s3101_s15 = sphi %s3138_s15, %s4452_s15   ;;  %s3097_s14 = sphi %s3136_s14, %s4451_s14   ;;  %s3093_s13 = sphi %s3134_s13, %s4450_s13   ;;  %s3089_s12 = sphi %s3132_s12, %s4449_s12  }
   0x7   : > { %s45_s18 = ssub.s32 %s3101_s15, %s3153_s16  ;;  %p55_p0 = scmp.ne.s32.totalorder %s3097_s14, %s3093_s13 }
   0x8   : > { %p46_p1 = scmp.eq.s32.totalorder %s45_s18, 0  ;;  %p56_p2 = scmp.eq.s32.totalorder %s3101_s15, 0 }
   0x9   : > { %p2702_p4 = scmp.lt.s32.totalorder %s3101_s15, 4  ;;  %s150_s20 = sand.u32 1, %s3101_s15  }
   0xa   : > { %s3162_s19 = scalar_select %p46_p1, %s3097_s14, %s48_s17  }
   0xb   : > { %p57_p3 = por %p56_p2, %p55_p0  ;;  %s152_s21 = sand.u32 1, %s3097_s14  }
   0xc   : > { %s2202_s22 = sshll.u32 %s152_s21, 11  ;;  %s2216_s23 = sshll.u32 %s3101_s15, 15 }
   0xd   : > { %s3176_s26 = scalar_lea.hbm %s4426_s1, %s2216_s23  ;;  %s154_s27 = scalar_lea.vmem [#allocation5], %s2202_s22 }
   0xe   : > { %s161_s28 = sshll.u32 %s154_s27, 4  ;;  %p3178_p5 = pnand %p2702_p4, %p57_p3  ;;  %s3182_s28 = int_to_ptr.vmem [resolvable:$true] %s161_s28 }
   0xf   : > { %s3184_s30 = scalar_lea.sflag [#allocation6], %s150_s20  ;;  %s2943_s4 = scalar_lea.hbm %s3176_s26, 32768 }
  0x10   : > { %p2944_p6 = scmp.ne.s32.totalorder %s3176_s26, %s2943_s4  ;;  %p2945_p7 = pneg %p3178_p5 }
  0x11   : > { %s2948_s7 = scalar_lea.hbm %s4426_s1, 131072  ;;  %p2949_p10 = scmp.lt.u32.totalorder %s3176_s26, %s4426_s1 }
  0x12   : > { %p2946_p8 = pnand %p2945_p7, %p2944_p6  ;;  %p2950_p11 = scmp.lt.u32.totalorder %s2948_s7, %s2943_s4 }
  0x13   : > { %p2952_p13 = scmp.lt.u32.totalorder %s2943_s4, %s3176_s26 }
  0x14   : > { %p2947_p9 = pneg %p2946_p8  ;;  %p2951_p12 = por %p2950_p11, %p2949_p10 }
  0x16   : > { %p2953_p1 = por %p2952_p13, %p2951_p12 }
  0x18   : > { %p2954_p2 = pnand %p2953_p1, %p2947_p9 }
  0x1a   : > { %2957 = shalt.err (!%p2954_p2)
}
  0x1b   : > { %s2958_s10 = scalar_lea.vmem %s3182_s28, 32768  ;;  %s3103_s11 = smov [#allocation5]  }
  0x1c   : > { %p2959_p3 = scmp.ne.s32.totalorder %s3182_s28, %s2958_s10  ;;  %s2963_s17 = sshll.u32 %s3103_s11, 4  ;;  %s2964_s17 = int_to_ptr.vmem [resolvable:$false] %s2963_s17 }
  0x1d   : > { %s2965_s18 = scalar_lea.vmem %s2964_s17, 65536  ;;  %p2966_p8 = scmp.lt.s32.totalorder %s3182_s28, %s2964_s17 }
  0x1e   : > { %p2961_p4 = pnand %p2959_p3, %p2945_p7  ;;  %p2967_p10 = scmp.lt.s32.totalorder %s2965_s18, %s2958_s10 }
  0x20   : > { %p2962_p6 = pneg %p2961_p4  ;;  %p2968_p11 = por %p2967_p10, %p2966_p8 }
  0x22   : > { %p2969_p12 = pnand %p2968_p11, %p2962_p6 }
  0x24   : > { %2972 = shalt.err (!%p2969_p12)
}
  0x25   : > { %s4434_s20 = smov 512   ;;  %s3105_s22 = smov 32  }
  0x26   : > { %2693 = dma.hbm_to_vmem [thread:$0]  (!%p3178_p5), %s3176_s26, 32768, %s3182_s28, %s3184_s30, %s4434_s20, %s4434_s20, %s3105_s22  }
  0x27   : > { %s3216_s23 = sadd.s32 4294967295, %s3101_s15   ;;  %s2198_s24 = sadd.s32 4294967294, %s3101_s15  }
  0x28   : > { %p61_p9 = scmp.ne.s32.totalorder %s3093_s13, %s3089_s12  ;;  %p4429_p13 = scmp.eq.s32.totalorder %s3216_s23, 0 }
  0x29   : > { %p111_p1 = scmp.eq.s32.totalorder %s3216_s23, 3  ;;  %p117_p2 = scmp.eq.s32.totalorder %s2198_s24, 3 }
  0x2a   : > { %p3225_p3 = por %p4429_p13, %p61_p9  ;;  %p2199_p4 = scmp.ge.s32.totalorder %s3101_s15, 1 }
  0x2b   : > { %p3233_p6 = por %p111_p1, %p55_p0  ;;  %p3237_p8 = por %p117_p2, %p61_p9 }
  0x2c   : > { %s4436_s25 = scalar_select %p3225_p3, 1, 0 }
  0x2d   : > { %s4437_s26 = scalar_select %p3233_p6, 1, 0 }
  0x2e   : > { %s4438_s27 = scalar_select %p3237_p8, 1, 0 }
  0x2f   : > { %p124_p10 = scmp.lt.s32.totalorder %s3101_s15, 5  ;;  %s2205_s28 = sshll.u32 %s152_s21, 2 }
  0x30   : > { %s3106_s5 = smov [#allocation2]   ;;  %s2217_s7 = sshll.u32 %s3101_s15, 6 }
  0x31   : > { %p3244_p11 = pnand %p2199_p4, %p124_p10  ;;  %s136_s6 = sshll.u32 %s3106_s5, 4  ;;  %s3248_s6 = int_to_ptr.vmem [resolvable:$true] %s136_s6 }
  0x32   : > { %s3256_s10 = scalar_lea.hbm %s4427_s2, %s2217_s7  ;;  %s175_s21 = scalar_lea.vmem [#allocation7], %s2205_s28 }
  0x33   : > { %s4439_s4 = scalar_select %p3244_p11, 1, 0 }
  0x34   : > { %p2686_p0 = pneg %p3244_p11  ;;  %s183_s11 = sshll.u32 %s175_s21, 4  ;;  %s184_s11 = int_to_ptr.vmem [resolvable:$true] %s183_s11 }
  0x35   : > { %s2973_s18 = scalar_lea.hbm %s3256_s10, 64  ;;  %s2978_s7 = scalar_lea.hbm %s4427_s2, 256 }
  0x36   : > { %p3260_p12 = pnand %p2686_p0, %p4429_p13  ;;  %p2974_p9 = scmp.ne.s32.totalorder %s3256_s10, %s2973_s18 }
  0x37   : > { %p2979_p4 = scmp.lt.u32.totalorder %s3256_s10, %s4427_s2  ;;  %p2980_p10 = scmp.lt.u32.totalorder %s2978_s7, %s2973_s18 }
  0x38   : > { %s4440_s17 = scalar_select %p3260_p12, 1, 0 }
  0x39   : > { %p2976_p1 = pnand %p2974_p9, %p2945_p7  ;;  %p2981_p0 = por %p2980_p10, %p2979_p4 }
  0x3a   : > { %p2982_p13 = scmp.lt.u32.totalorder %s2973_s18, %s3256_s10 }
  0x3b   : > { %p2977_p2 = pneg %p2976_p1 }
  0x3c   : > { %p2983_p8 = por %p2982_p13, %p2981_p0 }
  0x3e   : > { %p2984_p6 = pnand %p2983_p8, %p2977_p2 }
  0x40   : > { %2987 = shalt.err (!%p2984_p6)
}
  0x41   : > { %s2988_s28 = scalar_lea.vmem %s184_s11, 64  ;;  %s3107_s21 = smov [#allocation7]  }
  0x42   : > { %p2989_p3 = scmp.ne.s32.totalorder %s184_s11, %s2988_s28  ;;  %s2993_s24 = sshll.u32 %s3107_s21, 4  ;;  %s2994_s24 = int_to_ptr.vmem [resolvable:$false] %s2993_s24 }
  0x43   : > { %s2995_s5 = scalar_lea.vmem %s2994_s24, 128  ;;  %p2996_p11 = scmp.lt.s32.totalorder %s184_s11, %s2994_s24 }
  0x44   : > { %p2991_p9 = pnand %p2989_p3, %p2945_p7  ;;  %p2997_p12 = scmp.lt.s32.totalorder %s2995_s5, %s2988_s28 }
  0x46   : > { %p2992_p1 = pneg %p2991_p9  ;;  %p2998_p4 = por %p2997_p12, %p2996_p11 }
  0x48   : > { %p2999_p10 = pnand %p2998_p4, %p2992_p1 }
  0x4a   : > { %3002 = shalt.err (!%p2999_p10)
}
  0x4b   : > { %2696 = dma.hbm_to_vmem [thread:$0]  (!%p3178_p5), %s3256_s10, 64, %s184_s11, %s3184_s30  }
  0x4c   : > { %s3003_s8 = scalar_lea.hbm %s4425_s0, 12800  ;;  %p4441_p13 = scmp.ne.s32.totalorder %s4440_s17, 0 }
  0x4d   : > { %p3004_p7 = scmp.ne.s32.totalorder %s4425_s0, %s3003_s8  ;;  %p3010_p11 = scmp.lt.u32.totalorder %s3003_s8, %s4425_s0 }
  0x4e   : > { %p3005_p3 = pneg %p4441_p13 }
  0x50   : > { %p3006_p6 = pnand %p3005_p3, %p3004_p7 }
  0x52   : > { %p3007_p8 = pneg %p3006_p6 }
  0x54   : > { %p3012_p12 = pnand %p3010_p11, %p3007_p8 }
  0x56   : > { %3015 = shalt.err (!%p3012_p12)
}
  0x57   : > { %s3016_s29 = scalar_lea.vmem %s3248_s6, 12800  ;;  %p3024_p9 = scmp.lt.s32.totalorder %s3248_s6, %s3248_s6 }
  0x58   : > { %p3017_p5 = scmp.ne.s32.totalorder %s3248_s6, %s3016_s29  ;;  %p3025_p1 = scmp.lt.s32.totalorder %s3016_s29, %s3016_s29 }
  0x5a   : > { %p3019_p2 = pnand %p3017_p5, %p3005_p3  ;;  %p3026_p4 = por %p3025_p1, %p3024_p9 }
  0x5c   : > { %p3020_p0 = pneg %p3019_p2 }
  0x5e   : > { %p3027_p10 = pnand %p3026_p4, %p3020_p0 }
  0x60   : > { %3030 = shalt.err (!%p3027_p10)
}
  0x61   : > { %s4442_s30 = smov 512   ;;  %p4443_p7 = scmp.ne.s32.totalorder %s4439_s4, 0 }
  0x62   : > { %2689 = dma.hbm_to_vmem [thread:$0]  (!%p4441_p13), %s4425_s0, 12800, %s3248_s6, [#allocation3], %s4442_s30, %s4442_s30, %s3105_s22  }
  0x63   : > { %192 = sbr.rel (%p4443_p7) target bundleno = 670 (0x29e), region = 32  ;;  %p4444_p3 = scmp.eq.s32.totalorder (!%p4443_p7), %s3216_s23, 0 }
  0x6a   : > { %3076 = dma.done.wait (%p4444_p3), [#allocation3], 12800   ;;  %p4445_p6 = pmov %p4444_p3 }
  0x6b   : > { %s198_s11 = sand.u32 1, %s3216_s23   ;;  %s3316_s17 = sand.u32 1, %s3093_s13  }
  0x6c   : > { %3078 = vsyncadd (%p4445_p6), [#allocation3], 4294954496  ;;  %s2210_s24 = sshll.u32 %s3316_s17, 11  ;;  %s199_s5 = scalar_lea.sflag [#allocation6], %s198_s11 }
  0x6d   : > { %s3319_s18 = scalar_lea.vmem [#allocation5], %s2210_s24  ;;  %p4446_p13 = scmp.ne.s32.totalorder %s4436_s25, 0 }
  0x6f   : > { %3080 = dma.done.wait (%p4446_p13), %s199_s5, 32832  }
  0x70   : > { %3082 = vsyncadd (%p4446_p13), %s199_s5, 4294934464  ;;  %v342_v0 = vld [vmem:[%s3319_s18 + $0x8] sm:$0xff]  ;;  %v344_v2 = vld [vmem:[%s3319_s18 + $0x18] sm:$0xff]  ;;  %s2211_s22 = sshll.u32 %s3316_s17, 2  ;;  %s2675_s4 = smul.u32 800, %s3316_s17 }
  0x71   : > { %v346_v1 = vld [vmem:[%s3319_s18 + $0x28] sm:$0xff]  ;;  %v348_v4 = vld [vmem:[%s3319_s18 + $0x38] sm:$0xff]  ;;  %v341_v5 = vld [vmem:[%s3319_s18] sm:$0xff]  ;;  %s211_s25 = scalar_lea.vmem [#allocation7], %s2211_s22  ;;  %s2218_s7 = sshll.u32 %s3216_s23, 9 }
  0x72   : > { %v2219_v3 = vpack.c.bf16 %v346_v1, %v342_v0  ;;  %v345_v6 = vld [vmem:[%s3319_s18 + $0x20] sm:$0xff]  ;;  %v2347_v7 = vpack.c.bf16 %v348_v4, %v344_v2  ;;  %v343_v9 = vld [vmem:[%s3319_s18 + $0x10] sm:$0xff]  ;;  %v350_v11 = vld [vmem:[%s3319_s18 + $0x48] sm:$0xff]  ;;  %s3628_s6 = scalar_lea.vmem [#allocation8], %s2675_s4  ;;  %s4377_s23 = scalar_lea.hbm %s4428_s3, %s2218_s7 }
  0x73   : > { %v2221_v8 = vpack.c.bf16 %v345_v6, %v341_v5  ;;  %v347_v10 = vld [vmem:[%s3319_s18 + $0x30] sm:$0xff]  ;;  %v354_v13 = vld [vmem:[%s3319_s18 + $0x68] sm:$0xff]  ;;  %v352_v14 = vld [vmem:[%s3319_s18 + $0x58] sm:$0xff]  ;;  %s2093_s8 = sshll.u32 %s3628_s6, 4  ;;  %s2080_s21 = scalar_lea.sflag [#allocation4], %s3316_s17  ;;  %s4379_s8 = int_to_ptr.vmem [resolvable:$true] %s2093_s8 }
  0x74   : > { %2220 = vmatprep.subr.bf16.mxu0 %v2219_v3  ;;  %v2349_v12 = vpack.c.bf16 %v347_v10, %v343_v9  ;;  %v356_v15 = vld [vmem:[%s3319_s18 + $0x78] sm:$0xff]  ;;  %2348 = vmatprep.subr.bf16.mxu1 %v2347_v7  ;;  %v2223_v16 = vpack.c.bf16 %v354_v13, %v350_v11  ;;  %v349_v18 = vld [vmem:[%s3319_s18 + $0x40] sm:$0xff]  ;;  %v351_v20 = vld [vmem:[%s3319_s18 + $0x50] sm:$0xff]  ;;  %s3031_s29 = scalar_lea.vmem %s4379_s8, 12800  ;;  %p4447_p11 = scmp.ne.s32.totalorder %s4437_s26, 0 }
  0x75   : > { %2222 = vmatpush1.bf16.msra.mxu0 %v2221_v8  ;;  %v2351_v17 = vpack.c.bf16 %v356_v15, %v352_v14  ;;  %v353_v19 = vld [vmem:[%s3319_s18 + $0x60] sm:$0xff]  ;;  %v355_v22 = vld [vmem:[%s3319_s18 + $0x70] sm:$0xff]  ;;  %v358_v23 = vld [vmem:[%s3319_s18 + $0x88] sm:$0xff]  ;;  %p3032_p8 = scmp.ne.s32.totalorder %s4379_s8, %s3031_s29  ;;  %s3108_s30 = smov [#allocation8]  }
  0x76   : > { %2350 = vmatpush1.bf16.msra.mxu1 %v2349_v12  ;;  %v2225_v21 = vpack.c.bf16 %v353_v19, %v349_v18  ;;  %v362_v24 = vld [vmem:[%s3319_s18 + $0xa8] sm:$0xff]  ;;  %2224 = vmatprep.subr.bf16.mxu0 %v2223_v16  ;;  %v2353_v25 = vpack.c.bf16 %v355_v22, %v351_v20  ;;  %v360_v27 = vld [vmem:[%s3319_s18 + $0x98] sm:$0xff]  ;;  %v357_v29 = vld [vmem:[%s3319_s18 + $0x80] sm:$0xff]  ;;  %s3035_s20 = sshll.u32 %s3108_s30, 4  ;;  %s3036_s20 = int_to_ptr.vmem [resolvable:$false] %s3035_s20 }
  0x77   : > { %2352 = vmatprep.subr.bf16.mxu1 %v2351_v17  ;;  %v2227_v26 = vpack.c.bf16 %v362_v24, %v358_v23  ;;  %v364_v28 = vld [vmem:[%s3319_s18 + $0xb8] sm:$0xff]  ;;  %v361_v31 = vld [vmem:[%s3319_s18 + $0xa0] sm:$0xff]  ;;  %v359_v32 = vld [vmem:[%s3319_s18 + $0x90] sm:$0xff]  ;;  %p3033_p12 = pnand %p3032_p8, %p4447_p11  ;;  %s3037_s10 = scalar_lea.vmem %s3036_s20, 25600 }
  0x78   : > { %v2355_v30 = vpack.c.bf16 %v364_v28, %v360_v27  ;;  %v363_v33 = vld [vmem:[%s3319_s18 + $0xb0] sm:$0xff]  ;;  %v2229_v34 = vpack.c.bf16 %v361_v31, %v357_v29  ;;  %v366_v35 = vld [vmem:[%s3319_s18 + $0xc8] sm:$0xff]  ;;  %v368_v37 = vld [vmem:[%s3319_s18 + $0xd8] sm:$0xff]  ;;  %p3038_p2 = scmp.lt.s32.totalorder %s4379_s8, %s3036_s20  ;;  %p3039_p0 = scmp.lt.s32.totalorder %s3037_s10, %s3031_s29 }
  0x79   : > { %2226 = vmatpush1.bf16.msra.mxu0 %v2225_v21  ;;  %v370_v36 = vld [vmem:[%s3319_s18 + $0xe8] sm:$0xff]  ;;  %v2357_v38 = vpack.c.bf16 %v363_v33, %v359_v32  ;;  %v372_v40 = vld [vmem:[%s3319_s18 + $0xf8] sm:$0xff]  ;;  %v365_v41 = vld [vmem:[%s3319_s18 + $0xc0] sm:$0xff]  ;;  %p3034_p5 = pneg %p3033_p12 }
  0x7a   : > { %2354 = vmatpush1.bf16.msra.mxu1 %v2353_v25  ;;  %2228 = vmatprep.subr.bf16.mxu0 %v2227_v26  ;;  %v2231_v39 = vpack.c.bf16 %v370_v36, %v366_v35  ;;  %v369_v42 = vld [vmem:[%s3319_s18 + $0xe0] sm:$0xff]  ;;  %v2359_v43 = vpack.c.bf16 %v372_v40, %v368_v37  ;;  %v367_v44 = vld [vmem:[%s3319_s18 + $0xd0] sm:$0xff]  ;;  %v374_v46 = vld [vmem:[%s3319_s18 + $0x108] sm:$0xff]  ;;  %p3040_p9 = por %p3039_p0, %p3038_p2 }
  0x7b   : > { %2356 = vmatprep.subr.bf16.mxu1 %v2355_v30  ;;  %v371_v45 = vld [vmem:[%s3319_s18 + $0xf0] sm:$0xff]  ;;  %v378_v47 = vld [vmem:[%s3319_s18 + $0x128] sm:$0xff]  ;;  %v376_v48 = vld [vmem:[%s3319_s18 + $0x118] sm:$0xff]  ;;  %v2233_v50 = vpack.c.bf16 %v369_v42, %v365_v41 }
  0x7c   : > { %v380_v49 = vld [vmem:[%s3319_s18 + $0x138] sm:$0xff]  ;;  %v2361_v51 = vpack.c.bf16 %v371_v45, %v367_v44  ;;  %v2235_v52 = vpack.c.bf16 %v378_v47, %v374_v46  ;;  %v373_v53 = vld [vmem:[%s3319_s18 + $0x100] sm:$0xff]  ;;  %v375_v55 = vld [vmem:[%s3319_s18 + $0x110] sm:$0xff]  ;;  %p3041_p1 = pnand %p3040_p9, %p3034_p5 }
  0x7d   : > { %2230 = vmatpush1.bf16.msra.mxu0 %v2229_v34  ;;  %v377_v54 = vld [vmem:[%s3319_s18 + $0x120] sm:$0xff]  ;;  %v2363_v56 = vpack.c.bf16 %v380_v49, %v376_v48  ;;  %v379_v57 = vld [vmem:[%s3319_s18 + $0x130] sm:$0xff]  ;;  %v382_v58 = vld [vmem:[%s3319_s18 + $0x148] sm:$0xff] }
  0x7e   : > { %2358 = vmatpush1.bf16.msra.mxu1 %v2357_v38  ;;  %2232 = vmatprep.subr.bf16.mxu0 %v2231_v39  ;;  %v386_v59 = vld [vmem:[%s3319_s18 + $0x168] sm:$0xff]  ;;  %v384_v60 = vld [vmem:[%s3319_s18 + $0x158] sm:$0xff]  ;;  %v2237_v62 = vpack.c.bf16 %v377_v54, %v373_v53  ;;  %v2365_v63 = vpack.c.bf16 %v379_v57, %v375_v55  ;;  %v381_v1 = vld [vmem:[%s3319_s18 + $0x140] sm:$0xff] }
  0x7f   : > { %2360 = vmatprep.subr.bf16.mxu1 %v2359_v43  ;;  %v388_v61 = vld [vmem:[%s3319_s18 + $0x178] sm:$0xff]  ;;  %v2239_v0 = vpack.c.bf16 %v386_v59, %v382_v58  ;;  %v385_v2 = vld [vmem:[%s3319_s18 + $0x160] sm:$0xff]  ;;  %v383_v3 = vld [vmem:[%s3319_s18 + $0x150] sm:$0xff] }
  0x80   : > { %v2367_v4 = vpack.c.bf16 %v388_v61, %v384_v60  ;;  %v387_v5 = vld [vmem:[%s3319_s18 + $0x170] sm:$0xff]  ;;  %v390_v6 = vld [vmem:[%s3319_s18 + $0x188] sm:$0xff]  ;;  %v392_v8 = vld [vmem:[%s3319_s18 + $0x198] sm:$0xff]  ;;  %v2241_v10 = vpack.c.bf16 %v385_v2, %v381_v1 }
  0x81   : > { %2234 = vmatpush1.bf16.msra.mxu0 %v2233_v50  ;;  %v394_v7 = vld [vmem:[%s3319_s18 + $0x1a8] sm:$0xff]  ;;  %v396_v9 = vld [vmem:[%s3319_s18 + $0x1b8] sm:$0xff]  ;;  %v2369_v11 = vpack.c.bf16 %v387_v5, %v383_v3  ;;  %v389_v13 = vld [vmem:[%s3319_s18 + $0x180] sm:$0xff] }
  0x82   : > { %2362 = vmatpush1.bf16.msra.mxu1 %v2361_v51  ;;  %2236 = vmatprep.subr.bf16.mxu0 %v2235_v52  ;;  %v2243_v12 = vpack.c.bf16 %v394_v7, %v390_v6  ;;  %v393_v14 = vld [vmem:[%s3319_s18 + $0x1a0] sm:$0xff]  ;;  %v391_v15 = vld [vmem:[%s3319_s18 + $0x190] sm:$0xff]  ;;  %v2371_v16 = vpack.c.bf16 %v396_v9, %v392_v8  ;;  %v398_v18 = vld [vmem:[%s3319_s18 + $0x1c8] sm:$0xff] }
  0x83   : > { %2364 = vmatprep.subr.bf16.mxu1 %v2363_v56  ;;  %v395_v17 = vld [vmem:[%s3319_s18 + $0x1b0] sm:$0xff]  ;;  %v402_v19 = vld [vmem:[%s3319_s18 + $0x1e8] sm:$0xff]  ;;  %v400_v20 = vld [vmem:[%s3319_s18 + $0x1d8] sm:$0xff]  ;;  %v2245_v22 = vpack.c.bf16 %v393_v14, %v389_v13 }
  0x84   : > { %v404_v21 = vld [vmem:[%s3319_s18 + $0x1f8] sm:$0xff]  ;;  %v2373_v23 = vpack.c.bf16 %v395_v17, %v391_v15  ;;  %v2247_v24 = vpack.c.bf16 %v402_v19, %v398_v18  ;;  %v397_v25 = vld [vmem:[%s3319_s18 + $0x1c0] sm:$0xff]  ;;  %v399_v27 = vld [vmem:[%s3319_s18 + $0x1d0] sm:$0xff] }
  0x85   : > { %2238 = vmatpush1.bf16.msra.mxu0 %v2237_v62  ;;  %v401_v26 = vld [vmem:[%s3319_s18 + $0x1e0] sm:$0xff]  ;;  %v2375_v28 = vpack.c.bf16 %v404_v21, %v400_v20  ;;  %v403_v29 = vld [vmem:[%s3319_s18 + $0x1f0] sm:$0xff]  ;;  %v406_v30 = vld [vmem:[%s3319_s18 + $0x208] sm:$0xff] }
  0x86   : > { %2366 = vmatpush1.bf16.msra.mxu1 %v2365_v63  ;;  %2240 = vmatprep.subr.bf16.mxu0 %v2239_v0  ;;  %v410_v31 = vld [vmem:[%s3319_s18 + $0x228] sm:$0xff]  ;;  %v408_v32 = vld [vmem:[%s3319_s18 + $0x218] sm:$0xff]  ;;  %v2249_v34 = vpack.c.bf16 %v401_v26, %v397_v25  ;;  %v2377_v35 = vpack.c.bf16 %v403_v29, %v399_v27  ;;  %v405_v37 = vld [vmem:[%s3319_s18 + $0x200] sm:$0xff] }
  0x87   : > { %2368 = vmatprep.subr.bf16.mxu1 %v2367_v4  ;;  %v412_v33 = vld [vmem:[%s3319_s18 + $0x238] sm:$0xff]  ;;  %v2251_v36 = vpack.c.bf16 %v410_v31, %v406_v30  ;;  %v409_v38 = vld [vmem:[%s3319_s18 + $0x220] sm:$0xff]  ;;  %v407_v39 = vld [vmem:[%s3319_s18 + $0x210] sm:$0xff] }
  0x88   : > { %v2379_v40 = vpack.c.bf16 %v412_v33, %v408_v32  ;;  %v411_v41 = vld [vmem:[%s3319_s18 + $0x230] sm:$0xff]  ;;  %v414_v42 = vld [vmem:[%s3319_s18 + $0x248] sm:$0xff]  ;;  %v416_v44 = vld [vmem:[%s3319_s18 + $0x258] sm:$0xff]  ;;  %v2253_v46 = vpack.c.bf16 %v409_v38, %v405_v37 }
  0x89   : > { %2242 = vmatpush1.bf16.msra.mxu0 %v2241_v10  ;;  %v418_v43 = vld [vmem:[%s3319_s18 + $0x268] sm:$0xff]  ;;  %v420_v45 = vld [vmem:[%s3319_s18 + $0x278] sm:$0xff]  ;;  %v2381_v47 = vpack.c.bf16 %v411_v41, %v407_v39  ;;  %v413_v49 = vld [vmem:[%s3319_s18 + $0x240] sm:$0xff] }
  0x8a   : > { %2370 = vmatpush1.bf16.msra.mxu1 %v2369_v11  ;;  %2244 = vmatprep.subr.bf16.mxu0 %v2243_v12  ;;  %v2255_v48 = vpack.c.bf16 %v418_v43, %v414_v42  ;;  %v417_v50 = vld [vmem:[%s3319_s18 + $0x260] sm:$0xff]  ;;  %v415_v51 = vld [vmem:[%s3319_s18 + $0x250] sm:$0xff]  ;;  %v2383_v52 = vpack.c.bf16 %v420_v45, %v416_v44  ;;  %v422_v54 = vld [vmem:[%s3319_s18 + $0x288] sm:$0xff] }
  0x8b   : > { %2372 = vmatprep.subr.bf16.mxu1 %v2371_v16  ;;  %v419_v53 = vld [vmem:[%s3319_s18 + $0x270] sm:$0xff]  ;;  %v426_v55 = vld [vmem:[%s3319_s18 + $0x2a8] sm:$0xff]  ;;  %v424_v56 = vld [vmem:[%s3319_s18 + $0x298] sm:$0xff]  ;;  %v2257_v58 = vpack.c.bf16 %v417_v50, %v413_v49 }
  0x8c   : > { %v428_v57 = vld [vmem:[%s3319_s18 + $0x2b8] sm:$0xff]  ;;  %v2385_v59 = vpack.c.bf16 %v419_v53, %v415_v51  ;;  %v2259_v60 = vpack.c.bf16 %v426_v55, %v422_v54  ;;  %v421_v61 = vld [vmem:[%s3319_s18 + $0x280] sm:$0xff]  ;;  %v423_v63 = vld [vmem:[%s3319_s18 + $0x290] sm:$0xff] }
  0x8d   : > { %2246 = vmatpush1.bf16.msra.mxu0 %v2245_v22  ;;  %v425_v62 = vld [vmem:[%s3319_s18 + $0x2a0] sm:$0xff]  ;;  %v2387_v0 = vpack.c.bf16 %v428_v57, %v424_v56  ;;  %v427_v1 = vld [vmem:[%s3319_s18 + $0x2b0] sm:$0xff]  ;;  %v430_v2 = vld [vmem:[%s3319_s18 + $0x2c8] sm:$0xff] }
  0x8e   : > { %2374 = vmatpush1.bf16.msra.mxu1 %v2373_v23  ;;  %2248 = vmatprep.subr.bf16.mxu0 %v2247_v24  ;;  %v434_v3 = vld [vmem:[%s3319_s18 + $0x2e8] sm:$0xff]  ;;  %v432_v4 = vld [vmem:[%s3319_s18 + $0x2d8] sm:$0xff]  ;;  %v2261_v6 = vpack.c.bf16 %v425_v62, %v421_v61  ;;  %v429_v7 = vld [vmem:[%s3319_s18 + $0x2c0] sm:$0xff]  ;;  %v2389_v8 = vpack.c.bf16 %v427_v1, %v423_v63 }
  0x8f   : > { %2376 = vmatprep.subr.bf16.mxu1 %v2375_v28  ;;  %v436_v5 = vld [vmem:[%s3319_s18 + $0x2f8] sm:$0xff]  ;;  %v2263_v9 = vpack.c.bf16 %v434_v3, %v430_v2  ;;  %v433_v10 = vld [vmem:[%s3319_s18 + $0x2e0] sm:$0xff]  ;;  %v431_v11 = vld [vmem:[%s3319_s18 + $0x2d0] sm:$0xff] }
  0x90   : > { %v435_v12 = vld [vmem:[%s3319_s18 + $0x2f0] sm:$0xff]  ;;  %v2391_v13 = vpack.c.bf16 %v436_v5, %v432_v4  ;;  %v438_v14 = vld [vmem:[%s3319_s18 + $0x308] sm:$0xff]  ;;  %v440_v17 = vld [vmem:[%s3319_s18 + $0x318] sm:$0xff]  ;;  %v2265_v19 = vpack.c.bf16 %v433_v10, %v429_v7 }
  0x91   : > { %2250 = vmatpush1.bf16.msra.mxu0 %v2249_v34  ;;  %v442_v15 = vld [vmem:[%s3319_s18 + $0x328] sm:$0xff]  ;;  %v444_v18 = vld [vmem:[%s3319_s18 + $0x338] sm:$0xff]  ;;  %v2393_v20 = vpack.c.bf16 %v435_v12, %v431_v11  ;;  %v437_v22 = vld [vmem:[%s3319_s18 + $0x300] sm:$0xff] }
  0x92   : > { %2378 = vmatpush1.bf16.msra.mxu1 %v2377_v35  ;;  %2252 = vmatprep.subr.bf16.mxu0 %v2251_v36  ;;  %v242_v16 = vld [vmem:[#allocation2 + $0x8] sm:$0xff]  ;;  %v2267_v21 = vpack.c.bf16 %v442_v15, %v438_v14  ;;  %v441_v23 = vld [vmem:[%s3319_s18 + $0x320] sm:$0xff]  ;;  %v439_v24 = vld [vmem:[%s3319_s18 + $0x310] sm:$0xff]  ;;  %v2395_v25 = vpack.c.bf16 %v444_v18, %v440_v17 }
  0x93   : > { %2380 = vmatprep.subr.bf16.mxu1 %v2379_v40  ;;  %683 = vmatprep.mubr.f32.mxu0 %v242_v16  ;;  %v443_v26 = vld [vmem:[%s3319_s18 + $0x330] sm:$0xff]  ;;  %v446_v27 = vld [vmem:[%s3319_s18 + $0x348] sm:$0xff]  ;;  %v448_v29 = vld [vmem:[%s3319_s18 + $0x358] sm:$0xff]  ;;  %v2269_v31 = vpack.c.bf16 %v441_v23, %v437_v22 }
  0x94   : > { %1113 = vmatprep.mubr.f32.mxu1 %v242_v16  ;;  %v450_v28 = vld [vmem:[%s3319_s18 + $0x368] sm:$0xff]  ;;  %v452_v30 = vld [vmem:[%s3319_s18 + $0x378] sm:$0xff]  ;;  %v2397_v32 = vpack.c.bf16 %v443_v26, %v439_v24  ;;  %v445_v34 = vld [vmem:[%s3319_s18 + $0x340] sm:$0xff] }
  0x95   : > { %2254 = vmatpush1.bf16.msra.mxu0 %v2253_v46  ;;  %v2271_v33 = vpack.c.bf16 %v450_v28, %v446_v27  ;;  %v449_v35 = vld [vmem:[%s3319_s18 + $0x360] sm:$0xff]  ;;  %v447_v36 = vld [vmem:[%s3319_s18 + $0x350] sm:$0xff]  ;;  %v2399_v37 = vpack.c.bf16 %v452_v30, %v448_v29  ;;  %v454_v39 = vld [vmem:[%s3319_s18 + $0x388] sm:$0xff] }
  0x96   : > { %2382 = vmatpush1.bf16.msra.mxu1 %v2381_v47  ;;  %2256 = vmatprep.subr.bf16.mxu0 %v2255_v48  ;;  %v451_v38 = vld [vmem:[%s3319_s18 + $0x370] sm:$0xff]  ;;  %v458_v40 = vld [vmem:[%s3319_s18 + $0x3a8] sm:$0xff]  ;;  %v456_v41 = vld [vmem:[%s3319_s18 + $0x398] sm:$0xff]  ;;  %v2273_v43 = vpack.c.bf16 %v449_v35, %v445_v34 }
  0x97   : > { %2384 = vmatprep.subr.bf16.mxu1 %v2383_v52  ;;  %v460_v42 = vld [vmem:[%s3319_s18 + $0x3b8] sm:$0xff]  ;;  %v2401_v44 = vpack.c.bf16 %v451_v38, %v447_v36  ;;  %v2275_v45 = vpack.c.bf16 %v458_v40, %v454_v39  ;;  %v453_v46 = vld [vmem:[%s3319_s18 + $0x380] sm:$0xff]  ;;  %v455_v48 = vld [vmem:[%s3319_s18 + $0x390] sm:$0xff] }
  0x98   : > { %v457_v47 = vld [vmem:[%s3319_s18 + $0x3a0] sm:$0xff]  ;;  %v2403_v49 = vpack.c.bf16 %v460_v42, %v456_v41  ;;  %v459_v50 = vld [vmem:[%s3319_s18 + $0x3b0] sm:$0xff]  ;;  %v462_v51 = vld [vmem:[%s3319_s18 + $0x3c8] sm:$0xff] }
  0x99   : > { %2258 = vmatpush1.bf16.msra.mxu0 %v2257_v58  ;;  %v466_v52 = vld [vmem:[%s3319_s18 + $0x3e8] sm:$0xff]  ;;  %v464_v53 = vld [vmem:[%s3319_s18 + $0x3d8] sm:$0xff]  ;;  %v2277_v55 = vpack.c.bf16 %v457_v47, %v453_v46  ;;  %v2405_v56 = vpack.c.bf16 %v459_v50, %v455_v48  ;;  %v461_v58 = vld [vmem:[%s3319_s18 + $0x3c0] sm:$0xff] }
  0x9a   : > { %2386 = vmatpush1.bf16.msra.mxu1 %v2385_v59  ;;  %2260 = vmatprep.subr.bf16.mxu0 %v2259_v60  ;;  %v468_v54 = vld [vmem:[%s3319_s18 + $0x3f8] sm:$0xff]  ;;  %v2279_v57 = vpack.c.bf16 %v466_v52, %v462_v51  ;;  %v465_v59 = vld [vmem:[%s3319_s18 + $0x3e0] sm:$0xff]  ;;  %v463_v60 = vld [vmem:[%s3319_s18 + $0x3d0] sm:$0xff] }
  0x9b   : > { %2388 = vmatprep.subr.bf16.mxu1 %v2387_v0  ;;  %v2407_v61 = vpack.c.bf16 %v468_v54, %v464_v53  ;;  %v467_v62 = vld [vmem:[%s3319_s18 + $0x3f0] sm:$0xff]  ;;  %v470_v63 = vld [vmem:[%s3319_s18 + $0x408] sm:$0xff]  ;;  %v472_v1 = vld [vmem:[%s3319_s18 + $0x418] sm:$0xff]  ;;  %v2281_v3 = vpack.c.bf16 %v465_v59, %v461_v58 }
  0x9c   : > { %v474_v0 = vld [vmem:[%s3319_s18 + $0x428] sm:$0xff]  ;;  %v476_v2 = vld [vmem:[%s3319_s18 + $0x438] sm:$0xff]  ;;  %v2409_v4 = vpack.c.bf16 %v467_v62, %v463_v60  ;;  %v473_v7 = vld [vmem:[%s3319_s18 + $0x420] sm:$0xff] }
  0x9d   : > { %2262 = vmatpush1.bf16.msra.mxu0 %v2261_v6  ;;  %v2283_v5 = vpack.c.bf16 %v474_v0, %v470_v63  ;;  %v469_v6 = vld [vmem:[%s3319_s18 + $0x400] sm:$0xff]  ;;  %v475_v10 = vld [vmem:[%s3319_s18 + $0x430] sm:$0xff]  ;;  %v478_v11 = vld [vmem:[%s3319_s18 + $0x448] sm:$0xff] }
  0x9e   : > { %2390 = vmatpush1.bf16.msra.mxu1 %v2389_v8  ;;  %2264 = vmatprep.subr.bf16.mxu0 %v2263_v9  ;;  %v2411_v8 = vpack.c.bf16 %v476_v2, %v472_v1  ;;  %v471_v9 = vld [vmem:[%s3319_s18 + $0x410] sm:$0xff]  ;;  %v482_v12 = vld [vmem:[%s3319_s18 + $0x468] sm:$0xff]  ;;  %v2285_v14 = vpack.c.bf16 %v473_v7, %v469_v6  ;;  %v480_v15 = vld [vmem:[%s3319_s18 + $0x458] sm:$0xff] }
  0x9f   : > { %2392 = vmatprep.subr.bf16.mxu1 %v2391_v13  ;;  %v241_v13 = vld [vmem:[#allocation2] sm:$0xff]  ;;  %v484_v16 = vld [vmem:[%s3319_s18 + $0x478] sm:$0xff]  ;;  %v2413_v17 = vpack.c.bf16 %v475_v10, %v471_v9  ;;  %v246_v18 = vld [vmem:[#allocation2 + $0x28] sm:$0xff] }
  0xa0   : > { %v479_v22 = vld [vmem:[%s3319_s18 + $0x450] sm:$0xff]  ;;  %v2415_v23 = vpack.c.bf16 %v484_v16, %v480_v15  ;;  %v490_v26 = vld [vmem:[%s3319_s18 + $0x4a8] sm:$0xff]  ;;  %v245_v27 = vld [vmem:[#allocation2 + $0x20] sm:$0xff] }
  0xa1   : > { %2266 = vmatpush1.bf16.msra.mxu0 %v2265_v19  ;;  %v2287_v19 = vpack.c.bf16 %v482_v12, %v478_v11  ;;  %v483_v24 = vld [vmem:[%s3319_s18 + $0x470] sm:$0xff]  ;;  %v488_v28 = vld [vmem:[%s3319_s18 + $0x498] sm:$0xff]  ;;  %v250_v30 = vld [vmem:[#allocation2 + $0x48] sm:$0xff] }
  0xa2   : > { %2394 = vmatpush1.bf16.msra.mxu1 %v2393_v20  ;;  %2268 = vmatprep.subr.bf16.mxu0 %v2267_v21  ;;  %v477_v20 = vld [vmem:[%s3319_s18 + $0x440] sm:$0xff]  ;;  %v492_v29 = vld [vmem:[%s3319_s18 + $0x4b8] sm:$0xff]  ;;  %v487_v36 = vld [vmem:[%s3319_s18 + $0x490] sm:$0xff] }
  0xa3   : > { %2396 = vmatprep.subr.bf16.mxu1 %v2395_v25  ;;  %v481_v21 = vld [vmem:[%s3319_s18 + $0x460] sm:$0xff]  ;;  %v486_v25 = vld [vmem:[%s3319_s18 + $0x488] sm:$0xff]  ;;  %v491_v38 = vld [vmem:[%s3319_s18 + $0x4b0] sm:$0xff] }
  0xa4   : > { %v485_v34 = vld [vmem:[%s3319_s18 + $0x480] sm:$0xff]  ;;  %v494_v39 = vld [vmem:[%s3319_s18 + $0x4c8] sm:$0xff]  ;;  %v496_v42 = vld [vmem:[%s3319_s18 + $0x4d8] sm:$0xff]  ;;  %v2421_v46 = vpack.c.bf16 %v491_v38, %v487_v36 }
  0xa5   : > { %2270 = vmatpush1.bf16.msra.mxu0 %v2269_v31  ;;  %v2289_v31 = vpack.c.bf16 %v481_v21, %v477_v20  ;;  %v489_v35 = vld [vmem:[%s3319_s18 + $0x4a0] sm:$0xff]  ;;  %v498_v40 = vld [vmem:[%s3319_s18 + $0x4e8] sm:$0xff]  ;;  %v495_v50 = vld [vmem:[%s3319_s18 + $0x4d0] sm:$0xff] }
  0xa6   : > { %2398 = vmatpush1.bf16.msra.mxu1 %v2397_v32  ;;  %2272 = vmatprep.subr.bf16.mxu0 %v2271_v33  ;;  %v2417_v32 = vpack.c.bf16 %v483_v24, %v479_v22  ;;  %v2291_v33 = vpack.c.bf16 %v490_v26, %v486_v25  ;;  %v249_v41 = vld [vmem:[#allocation2 + $0x40] sm:$0xff]  ;;  %v2295_v47 = vpack.c.bf16 %v498_v40, %v494_v39  ;;  %v499_v52 = vld [vmem:[%s3319_s18 + $0x4f0] sm:$0xff]  ;;  %v502_v53 = vld [vmem:[%s3319_s18 + $0x508] sm:$0xff] }
  0xa7   : > { %2400 = vmatprep.subr.bf16.mxu1 %v2399_v37  ;;  %v2419_v37 = vpack.c.bf16 %v492_v29, %v488_v28  ;;  %v493_v48 = vld [vmem:[%s3319_s18 + $0x4c0] sm:$0xff]  ;;  %v506_v54 = vld [vmem:[%s3319_s18 + $0x528] sm:$0xff]  ;;  %v2425_v60 = vpack.c.bf16 %v499_v52, %v495_v50  ;;  %v503_v0 = vld [vmem:[%s3319_s18 + $0x510] sm:$0xff] }
  0xa8   : > { %v258_v58 = vld [vmem:[#allocation2 + $0x88] sm:$0xff]  ;;  %v501_v62 = vld [vmem:[%s3319_s18 + $0x500] sm:$0xff]  ;;  %v507_v2 = vld [vmem:[%s3319_s18 + $0x530] sm:$0xff] }
  0xa9   : > { %2274 = vmatpush1.bf16.msra.mxu0 %v2273_v43  ;;  %v500_v43 = vld [vmem:[%s3319_s18 + $0x4f8] sm:$0xff]  ;;  %v505_v63 = vld [vmem:[%s3319_s18 + $0x520] sm:$0xff]  ;;  %v2429_v10 = vpack.c.bf16 %v507_v2, %v503_v0  ;;  %v515_v16 = vld [vmem:[%s3319_s18 + $0x570] sm:$0xff] }
  0xaa   : > { %2402 = vmatpush1.bf16.msra.mxu1 %v2401_v44  ;;  %2276 = vmatprep.subr.bf16.mxu0 %v2275_v45  ;;  %v254_v44 = vld [vmem:[#allocation2 + $0x68] sm:$0xff]  ;;  %v2293_v45 = vpack.c.bf16 %v489_v35, %v485_v34  ;;  %v2423_v51 = vpack.c.bf16 %v500_v43, %v496_v42  ;;  %v512_v6 = vld [vmem:[%s3319_s18 + $0x558] sm:$0xff]  ;;  %v2301_v9 = vpack.c.bf16 %v505_v63, %v501_v62  ;;  %v509_v12 = vld [vmem:[%s3319_s18 + $0x540] sm:$0xff] }
  0xab   : > { %2404 = vmatprep.subr.bf16.mxu1 %v2403_v49  ;;  %v497_v49 = vld [vmem:[%s3319_s18 + $0x4e0] sm:$0xff]  ;;  %v516_v7 = vld [vmem:[%s3319_s18 + $0x578] sm:$0xff]  ;;  %v266_v22 = vld [vmem:[#allocation2 + $0xc8] sm:$0xff] }
  0xac   : > { %v2297_v59 = vpack.c.bf16 %v497_v49, %v493_v48  ;;  %v2431_v15 = vpack.c.bf16 %v516_v7, %v512_v6  ;;  %v520_v20 = vld [vmem:[%s3319_s18 + $0x598] sm:$0xff]  ;;  %v517_v26 = vld [vmem:[%s3319_s18 + $0x580] sm:$0xff]  ;;  %v519_v28 = vld [vmem:[%s3319_s18 + $0x590] sm:$0xff] }
  0xad   : > { %2278 = vmatpush1.bf16.msra.mxu0 %v2277_v55  ;;  %v253_v55 = vld [vmem:[#allocation2 + $0x60] sm:$0xff]  ;;  %v524_v21 = vld [vmem:[%s3319_s18 + $0x5b8] sm:$0xff]  ;;  %v270_v36 = vld [vmem:[#allocation2 + $0xe8] sm:$0xff] }
  0xae   : > { %2406 = vmatpush1.bf16.msra.mxu1 %v2405_v56  ;;  %2280 = vmatprep.subr.bf16.mxu0 %v2279_v57  ;;  %v504_v56 = vld [vmem:[%s3319_s18 + $0x518] sm:$0xff]  ;;  %v2435_v29 = vpack.c.bf16 %v524_v21, %v520_v20  ;;  %v525_v40 = vld [vmem:[%s3319_s18 + $0x5c0] sm:$0xff]  ;;  %v527_v42 = vld [vmem:[%s3319_s18 + $0x5d0] sm:$0xff] }
  0xaf   : > { %2408 = vmatprep.subr.bf16.mxu1 %v2407_v61  ;;  %v508_v57 = vld [vmem:[%s3319_s18 + $0x538] sm:$0xff]  ;;  %v2299_v61 = vpack.c.bf16 %v506_v54, %v502_v53  ;;  %v274_v50 = vld [vmem:[#allocation2 + $0x108] sm:$0xff]  ;;  %v533_v54 = vld [vmem:[%s3319_s18 + $0x600] sm:$0xff] }
  0xb0   : > { %v2427_v1 = vpack.c.bf16 %v508_v57, %v504_v56  ;;  %v528_v34 = vld [vmem:[%s3319_s18 + $0x5d8] sm:$0xff]  ;;  %v535_v56 = vld [vmem:[%s3319_s18 + $0x610] sm:$0xff]  ;;  %v278_v0 = vld [vmem:[#allocation2 + $0x128] sm:$0xff] }
  0xb1   : > { %2282 = vmatpush1.bf16.msra.mxu0 %v2281_v3  ;;  %v510_v3 = vld [vmem:[%s3319_s18 + $0x548] sm:$0xff]  ;;  %v532_v35 = vld [vmem:[%s3319_s18 + $0x5f8] sm:$0xff]  ;;  %v543_v6 = vld [vmem:[%s3319_s18 + $0x650] sm:$0xff] }
  0xb2   : > { %2410 = vmatpush1.bf16.msra.mxu1 %v2409_v4  ;;  %2284 = vmatprep.subr.bf16.mxu0 %v2283_v5  ;;  %v514_v4 = vld [vmem:[%s3319_s18 + $0x568] sm:$0xff]  ;;  %v257_v5 = vld [vmem:[#allocation2 + $0x80] sm:$0xff]  ;;  %v2439_v43 = vpack.c.bf16 %v532_v35, %v528_v34  ;;  %v536_v48 = vld [vmem:[%s3319_s18 + $0x618] sm:$0xff] }
  0xb3   : > { %2412 = vmatprep.subr.bf16.mxu1 %v2411_v8  ;;  %v262_v8 = vld [vmem:[#allocation2 + $0xa8] sm:$0xff]  ;;  %v2303_v11 = vpack.c.bf16 %v514_v4, %v510_v3  ;;  %v540_v49 = vld [vmem:[%s3319_s18 + $0x638] sm:$0xff]  ;;  %v541_v4 = vld [vmem:[%s3319_s18 + $0x640] sm:$0xff] }
  0xb4   : > { %684 = vmatmul.mubr.f32.vlgmr.msra.gmra.mrb[0].mxu0 %v241_v13  ;;  %v2443_v57 = vpack.c.bf16 %v540_v49, %v536_v48  ;;  %v544_v62 = vld [vmem:[%s3319_s18 + $0x658] sm:$0xff]  ;;  %v551_v20 = vld [vmem:[%s3319_s18 + $0x690] sm:$0xff] }
  0xb5   : > { %1114 = vmatmul.mubr.f32.vlgmr.msra.gmra.mrb[0].mxu1 %v241_v13  ;;  %2286 = vmatpush1.bf16.msra.mxu0 %v2285_v14  ;;  %v513_v13 = vld [vmem:[%s3319_s18 + $0x560] sm:$0xff]  ;;  %v511_v14 = vld [vmem:[%s3319_s18 + $0x550] sm:$0xff]  ;;  %v548_v63 = vld [vmem:[%s3319_s18 + $0x678] sm:$0xff] }
  0xb6   : > { %2414 = vmatpush1.bf16.msra.mxu1 %v2413_v17  ;;  %689 = vmatprep.mubr.f32.mxu0 %v246_v18  ;;  %v518_v17 = vld [vmem:[%s3319_s18 + $0x588] sm:$0xff]  ;;  %v2433_v24 = vpack.c.bf16 %v515_v16, %v511_v14  ;;  %v2447_v7 = vpack.c.bf16 %v548_v63, %v544_v62  ;;  %v559_v34 = vld [vmem:[%s3319_s18 + $0x6d0] sm:$0xff] }
  0xb7   : > { %1119 = vmatprep.mubr.f32.mxu1 %v246_v18  ;;  %2288 = vmatprep.subr.bf16.mxu0 %v2287_v19  ;;  %v522_v18 = vld [vmem:[%s3319_s18 + $0x5a8] sm:$0xff]  ;;  %v261_v19 = vld [vmem:[#allocation2 + $0xa0] sm:$0xff]  ;;  %v567_v48 = vld [vmem:[%s3319_s18 + $0x710] sm:$0xff] }
  0xb8   : > { %690 = vmatmul.mubr.f32.gmra.mrb[2].mxu0 %v245_v27  ;;  %2416 = vmatprep.subr.bf16.mxu1 %v2415_v23  ;;  %v2305_v23 = vpack.c.bf16 %v513_v13, %v509_v12  ;;  %v2307_v25 = vpack.c.bf16 %v522_v18, %v518_v17  ;;  %v552_v12 = vld [vmem:[%s3319_s18 + $0x698] sm:$0xff]  ;;  %v282_v14 = vld [vmem:[#allocation2 + $0x148] sm:$0xff]  ;;  %v549_v18 = vld [vmem:[%s3319_s18 + $0x680] sm:$0xff] }
  0xb9   : > { %1120 = vmatmul.mubr.f32.gmra.mrb[2].mxu1 %v245_v27  ;;  %695 = vmatprep.mubr.f32.mxu0 %v250_v30  ;;  %v521_v27 = vld [vmem:[%s3319_s18 + $0x5a0] sm:$0xff]  ;;  %v556_v13 = vld [vmem:[%s3319_s18 + $0x6b8] sm:$0xff]  ;;  %v575_v62 = vld [vmem:[%s3319_s18 + $0x750] sm:$0xff] }
  0xba   : > { %1125 = vmatprep.mubr.f32.mxu1 %v250_v30  ;;  %2290 = vmatpush1.bf16.msra.mxu0 %v2289_v31  ;;  %v523_v30 = vld [vmem:[%s3319_s18 + $0x5b0] sm:$0xff]  ;;  %v526_v31 = vld [vmem:[%s3319_s18 + $0x5c8] sm:$0xff]  ;;  %v2451_v21 = vpack.c.bf16 %v556_v13, %v552_v12 }
  0xbb   : > { %2418 = vmatpush1.bf16.msra.mxu1 %v2417_v32  ;;  %2292 = vmatprep.subr.bf16.mxu0 %v2291_v33  ;;  %v530_v32 = vld [vmem:[%s3319_s18 + $0x5e8] sm:$0xff]  ;;  %v265_v33 = vld [vmem:[#allocation2 + $0xc0] sm:$0xff]  ;;  %v2437_v38 = vpack.c.bf16 %v523_v30, %v519_v28  ;;  %v583_v12 = vld [vmem:[%s3319_s18 + $0x790] sm:$0xff] }
  0xbc   : > { %696 = vmatmul.mubr.f32.gmra.mrb[4].mxu0 %v249_v41  ;;  %2420 = vmatprep.subr.bf16.mxu1 %v2419_v37  ;;  %v2309_v37 = vpack.c.bf16 %v521_v27, %v517_v26  ;;  %v2311_v39 = vpack.c.bf16 %v530_v32, %v526_v31  ;;  %v560_v26 = vld [vmem:[%s3319_s18 + $0x6d8] sm:$0xff]  ;;  %v286_v28 = vld [vmem:[#allocation2 + $0x168] sm:$0xff]  ;;  %v557_v32 = vld [vmem:[%s3319_s18 + $0x6c0] sm:$0xff] }
  0xbd   : > { %1126 = vmatmul.mubr.f32.gmra.mrb[4].mxu1 %v249_v41  ;;  %701 = vmatprep.mubr.f32.mxu0 %v254_v44  ;;  %v529_v41 = vld [vmem:[%s3319_s18 + $0x5e0] sm:$0xff]  ;;  %v564_v27 = vld [vmem:[%s3319_s18 + $0x6f8] sm:$0xff] }
  0xbe   : > { %1131 = vmatprep.mubr.f32.mxu1 %v254_v44  ;;  %2294 = vmatpush1.bf16.msra.mxu0 %v2293_v45  ;;  %v531_v44 = vld [vmem:[%s3319_s18 + $0x5f0] sm:$0xff]  ;;  %v534_v45 = vld [vmem:[%s3319_s18 + $0x608] sm:$0xff]  ;;  %v2455_v35 = vpack.c.bf16 %v564_v27, %v560_v26 }
  0xbf   : > { %2422 = vmatpush1.bf16.msra.mxu1 %v2421_v46  ;;  %2296 = vmatprep.subr.bf16.mxu0 %v2295_v47  ;;  %v538_v46 = vld [vmem:[%s3319_s18 + $0x628] sm:$0xff]  ;;  %v269_v47 = vld [vmem:[#allocation2 + $0xe0] sm:$0xff]  ;;  %v2441_v52 = vpack.c.bf16 %v531_v44, %v527_v42  ;;  %v591_v27 = vld [vmem:[%s3319_s18 + $0x7d0] sm:$0xff] }
  0xc0   : > { %702 = vmatmul.mubr.f32.gmra.mrb[6].mxu0 %v253_v55  ;;  %2424 = vmatprep.subr.bf16.mxu1 %v2423_v51  ;;  %v2313_v51 = vpack.c.bf16 %v529_v41, %v525_v40  ;;  %v2315_v53 = vpack.c.bf16 %v538_v46, %v534_v45  ;;  %v568_v40 = vld [vmem:[%s3319_s18 + $0x718] sm:$0xff]  ;;  %v290_v42 = vld [vmem:[#allocation2 + $0x188] sm:$0xff]  ;;  %v565_v46 = vld [vmem:[%s3319_s18 + $0x700] sm:$0xff] }
  0xc1   : > { %1132 = vmatmul.mubr.f32.gmra.mrb[6].mxu1 %v253_v55  ;;  %707 = vmatprep.mubr.f32.mxu0 %v258_v58  ;;  %v537_v55 = vld [vmem:[%s3319_s18 + $0x620] sm:$0xff]  ;;  %v572_v41 = vld [vmem:[%s3319_s18 + $0x738] sm:$0xff] }
  0xc2   : > { %1137 = vmatprep.mubr.f32.mxu1 %v258_v58  ;;  %2298 = vmatpush1.bf16.msra.mxu0 %v2297_v59  ;;  %v539_v58 = vld [vmem:[%s3319_s18 + $0x630] sm:$0xff]  ;;  %v542_v59 = vld [vmem:[%s3319_s18 + $0x648] sm:$0xff]  ;;  %v2459_v49 = vpack.c.bf16 %v572_v41, %v568_v40  ;;  %v321_v41 = vld [vmem:[#allocation2 + $0x280] sm:$0xff] }
  0xc3   : > { %2426 = vmatpush1.bf16.msra.mxu1 %v2425_v60  ;;  %2300 = vmatprep.subr.bf16.mxu0 %v2299_v61  ;;  %v546_v60 = vld [vmem:[%s3319_s18 + $0x668] sm:$0xff]  ;;  %v273_v61 = vld [vmem:[#allocation2 + $0x100] sm:$0xff]  ;;  %v2445_v2 = vpack.c.bf16 %v539_v58, %v535_v56 }
  0xc4   : > { %708 = vmatmul.mubr.f32.gmra.mrb[8].mxu0 %v257_v5  ;;  %2428 = vmatprep.subr.bf16.mxu1 %v2427_v1  ;;  %v2317_v1 = vpack.c.bf16 %v537_v55, %v533_v54  ;;  %v2319_v3 = vpack.c.bf16 %v546_v60, %v542_v59  ;;  %v576_v54 = vld [vmem:[%s3319_s18 + $0x758] sm:$0xff]  ;;  %v294_v56 = vld [vmem:[#allocation2 + $0x1a8] sm:$0xff]  ;;  %v573_v60 = vld [vmem:[%s3319_s18 + $0x740] sm:$0xff] }
  0xc5   : > { %1138 = vmatmul.mubr.f32.gmra.mrb[8].mxu1 %v257_v5  ;;  %713 = vmatprep.mubr.f32.mxu0 %v262_v8  ;;  %v545_v5 = vld [vmem:[%s3319_s18 + $0x660] sm:$0xff]  ;;  %v580_v55 = vld [vmem:[%s3319_s18 + $0x778] sm:$0xff]  ;;  %v322_v40 = vld [vmem:[#allocation2 + $0x288] sm:$0xff] }
  0xc6   : > { %1143 = vmatprep.mubr.f32.mxu1 %v262_v8  ;;  %2302 = vmatpush1.bf16.msra.mxu0 %v2301_v9  ;;  %v547_v8 = vld [vmem:[%s3319_s18 + $0x670] sm:$0xff]  ;;  %v550_v9 = vld [vmem:[%s3319_s18 + $0x688] sm:$0xff]  ;;  %v2463_v63 = vpack.c.bf16 %v580_v55, %v576_v54  ;;  %v252_v54 = vld [vmem:[#allocation2 + $0x58] sm:$0xff] }
  0xc7   : > { %2430 = vmatpush1.bf16.msra.mxu1 %v2429_v10  ;;  %2304 = vmatprep.subr.bf16.mxu0 %v2303_v11  ;;  %v554_v10 = vld [vmem:[%s3319_s18 + $0x6a8] sm:$0xff]  ;;  %v277_v11 = vld [vmem:[#allocation2 + $0x120] sm:$0xff]  ;;  %v2449_v16 = vpack.c.bf16 %v547_v8, %v543_v6  ;;  %v251_v55 = vld [vmem:[#allocation2 + $0x50] sm:$0xff] }
  0xc8   : > { %714 = vmatmul.mubr.f32.gmra.mrb[10].mxu0 %v261_v19  ;;  %2432 = vmatprep.subr.bf16.mxu1 %v2431_v15  ;;  %v2321_v15 = vpack.c.bf16 %v545_v5, %v541_v4  ;;  %v2323_v17 = vpack.c.bf16 %v554_v10, %v550_v9  ;;  %v584_v4 = vld [vmem:[%s3319_s18 + $0x798] sm:$0xff]  ;;  %v298_v6 = vld [vmem:[#allocation2 + $0x1c8] sm:$0xff]  ;;  %v581_v10 = vld [vmem:[%s3319_s18 + $0x780] sm:$0xff] }
  0xc9   : > { %1144 = vmatmul.mubr.f32.gmra.mrb[10].mxu1 %v261_v19  ;;  %719 = vmatprep.mubr.f32.mxu0 %v266_v22  ;;  %v553_v19 = vld [vmem:[%s3319_s18 + $0x6a0] sm:$0xff]  ;;  %v588_v5 = vld [vmem:[%s3319_s18 + $0x7b8] sm:$0xff] }
  0xca   : > { %1149 = vmatprep.mubr.f32.mxu1 %v266_v22  ;;  %2306 = vmatpush1.bf16.msra.mxu0 %v2305_v23  ;;  %v555_v22 = vld [vmem:[%s3319_s18 + $0x6b0] sm:$0xff]  ;;  %v558_v23 = vld [vmem:[%s3319_s18 + $0x6c8] sm:$0xff]  ;;  %v2467_v13 = vpack.c.bf16 %v588_v5, %v584_v4  ;;  %v280_v4 = vld [vmem:[#allocation2 + $0x138] sm:$0xff] }
  0xcb   : > { %2434 = vmatpush1.bf16.msra.mxu1 %v2433_v24  ;;  %2308 = vmatprep.subr.bf16.mxu0 %v2307_v25  ;;  %v562_v24 = vld [vmem:[%s3319_s18 + $0x6e8] sm:$0xff]  ;;  %v281_v25 = vld [vmem:[#allocation2 + $0x140] sm:$0xff]  ;;  %v2453_v30 = vpack.c.bf16 %v555_v22, %v551_v20  ;;  %v279_v5 = vld [vmem:[#allocation2 + $0x130] sm:$0xff] }
  0xcc   : > { %720 = vmatmul.mubr.f32.gmra.mrb[12].mxu0 %v265_v33  ;;  %2436 = vmatprep.subr.bf16.mxu1 %v2435_v29  ;;  %v2325_v29 = vpack.c.bf16 %v553_v19, %v549_v18  ;;  %v2327_v31 = vpack.c.bf16 %v562_v24, %v558_v23  ;;  %v592_v18 = vld [vmem:[%s3319_s18 + $0x7d8] sm:$0xff]  ;;  %v302_v20 = vld [vmem:[#allocation2 + $0x1e8] sm:$0xff]  ;;  %v589_v24 = vld [vmem:[%s3319_s18 + $0x7c0] sm:$0xff] }
  0xcd   : > { %1150 = vmatmul.mubr.f32.gmra.mrb[12].mxu1 %v265_v33  ;;  %725 = vmatprep.mubr.f32.mxu0 %v270_v36  ;;  %v561_v33 = vld [vmem:[%s3319_s18 + $0x6e0] sm:$0xff]  ;;  %v596_v19 = vld [vmem:[%s3319_s18 + $0x7f8] sm:$0xff] }
  0xce   : > { %1155 = vmatprep.mubr.f32.mxu1 %v270_v36  ;;  %2310 = vmatpush1.bf16.msra.mxu0 %v2309_v37  ;;  %v563_v36 = vld [vmem:[%s3319_s18 + $0x6f0] sm:$0xff]  ;;  %v566_v37 = vld [vmem:[%s3319_s18 + $0x708] sm:$0xff]  ;;  %v2471_v26 = vpack.c.bf16 %v596_v19, %v592_v18  ;;  %v308_v18 = vld [vmem:[#allocation2 + $0x218] sm:$0xff] }
  0xcf   : > { %2438 = vmatpush1.bf16.msra.mxu1 %v2437_v38  ;;  %2312 = vmatprep.subr.bf16.mxu0 %v2311_v39  ;;  %v570_v38 = vld [vmem:[%s3319_s18 + $0x728] sm:$0xff]  ;;  %v285_v39 = vld [vmem:[#allocation2 + $0x160] sm:$0xff]  ;;  %v2457_v44 = vpack.c.bf16 %v563_v36, %v559_v34  ;;  %v307_v19 = vld [vmem:[#allocation2 + $0x210] sm:$0xff] }
  0xd0   : > { %726 = vmatmul.mubr.f32.gmra.mrb[14].mxu0 %v269_v47  ;;  %2440 = vmatprep.subr.bf16.mxu1 %v2439_v43  ;;  %v2329_v43 = vpack.c.bf16 %v561_v33, %v557_v32  ;;  %v2331_v45 = vpack.c.bf16 %v570_v38, %v566_v37  ;;  %v305_v33 = vld [vmem:[#allocation2 + $0x200] sm:$0xff]  ;;  %v310_v34 = vld [vmem:[#allocation2 + $0x228] sm:$0xff] }
  0xd1   : > { %1156 = vmatmul.mubr.f32.gmra.mrb[14].mxu1 %v269_v47  ;;  %731 = vmatprep.mubr.f32.mxu0 %v274_v50  ;;  %v569_v47 = vld [vmem:[%s3319_s18 + $0x720] sm:$0xff]  ;;  %v314_v36 = vld [vmem:[#allocation2 + $0x248] sm:$0xff] }
  0xd2   : > { %1161 = vmatprep.mubr.f32.mxu1 %v274_v50  ;;  %2314 = vmatpush1.bf16.msra.mxu0 %v2313_v51  ;;  %v571_v50 = vld [vmem:[%s3319_s18 + $0x730] sm:$0xff]  ;;  %v574_v51 = vld [vmem:[%s3319_s18 + $0x748] sm:$0xff]  ;;  %v313_v37 = vld [vmem:[#allocation2 + $0x240] sm:$0xff] }
  0xd3   : > { %2442 = vmatpush1.bf16.msra.mxu1 %v2441_v52  ;;  %2316 = vmatprep.subr.bf16.mxu0 %v2315_v53  ;;  %v578_v52 = vld [vmem:[%s3319_s18 + $0x768] sm:$0xff]  ;;  %v289_v53 = vld [vmem:[#allocation2 + $0x180] sm:$0xff]  ;;  %v2461_v58 = vpack.c.bf16 %v571_v50, %v567_v48  ;;  %v244_v50 = vld [vmem:[#allocation2 + $0x18] sm:$0xff] }
  0xd4   : > { %732 = vmatmul.mubr.f32.gmra.mrb[16].mxu0 %v273_v61  ;;  %2444 = vmatprep.subr.bf16.mxu1 %v2443_v57  ;;  %v2333_v57 = vpack.c.bf16 %v569_v47, %v565_v46  ;;  %v2335_v59 = vpack.c.bf16 %v578_v52, %v574_v51  ;;  %v318_v38 = vld [vmem:[#allocation2 + $0x268] sm:$0xff]  ;;  %v333_v47 = vld [vmem:[#allocation2 + $0x2e0] sm:$0xff]  ;;  %v243_v51 = vld [vmem:[#allocation2 + $0x10] sm:$0xff] }
  0xd5   : > { %1162 = vmatmul.mubr.f32.gmra.mrb[16].mxu1 %v273_v61  ;;  %737 = vmatprep.mubr.f32.mxu0 %v278_v0  ;;  %v577_v61 = vld [vmem:[%s3319_s18 + $0x760] sm:$0xff]  ;;  %v334_v46 = vld [vmem:[#allocation2 + $0x2e8] sm:$0xff]  ;;  %v248_v52 = vld [vmem:[#allocation2 + $0x38] sm:$0xff] }
  0xd6   : > { %1167 = vmatprep.mubr.f32.mxu1 %v278_v0  ;;  %2318 = vmatpush1.bf16.msra.mxu0 %v2317_v1  ;;  %v579_v0 = vld [vmem:[%s3319_s18 + $0x770] sm:$0xff]  ;;  %v582_v1 = vld [vmem:[%s3319_s18 + $0x788] sm:$0xff] }
  0xd7   : > { %2446 = vmatpush1.bf16.msra.mxu1 %v2445_v2  ;;  %2320 = vmatprep.subr.bf16.mxu0 %v2319_v3  ;;  %v586_v2 = vld [vmem:[%s3319_s18 + $0x7a8] sm:$0xff]  ;;  %v293_v3 = vld [vmem:[#allocation2 + $0x1a0] sm:$0xff]  ;;  %v2465_v8 = vpack.c.bf16 %v579_v0, %v575_v62  ;;  %v268_v62 = vld [vmem:[#allocation2 + $0xd8] sm:$0xff] }
  0xd8   : > { %738 = vmatmul.mubr.f32.gmra.mrb[18].mxu0 %v277_v11  ;;  %2448 = vmatprep.subr.bf16.mxu1 %v2447_v7  ;;  %v2337_v7 = vpack.c.bf16 %v577_v61, %v573_v60  ;;  %v2339_v9 = vpack.c.bf16 %v586_v2, %v582_v1  ;;  %v338_v48 = vld [vmem:[#allocation2 + $0x308] sm:$0xf]  ;;  %v264_v60 = vld [vmem:[#allocation2 + $0xb8] sm:$0xff]  ;;  %v263_v61 = vld [vmem:[#allocation2 + $0xb0] sm:$0xff] }
  0xd9   : > { %1168 = vmatmul.mubr.f32.gmra.mrb[18].mxu1 %v277_v11  ;;  %743 = vmatprep.mubr.f32.mxu0 %v282_v14  ;;  %v585_v11 = vld [vmem:[%s3319_s18 + $0x7a0] sm:$0xff]  ;;  %v272_v0 = vld [vmem:[#allocation2 + $0xf8] sm:$0xff]  ;;  %v271_v1 = vld [vmem:[#allocation2 + $0xf0] sm:$0xff] }
  0xda   : > { %1173 = vmatprep.mubr.f32.mxu1 %v282_v14  ;;  %2322 = vmatpush1.bf16.msra.mxu0 %v2321_v15  ;;  %v587_v14 = vld [vmem:[%s3319_s18 + $0x7b0] sm:$0xff]  ;;  %v590_v15 = vld [vmem:[%s3319_s18 + $0x7c8] sm:$0xff]  ;;  %v276_v2 = vld [vmem:[#allocation2 + $0x118] sm:$0xff] }
  0xdb   : > { %2450 = vmatpush1.bf16.msra.mxu1 %v2449_v16  ;;  %2324 = vmatprep.subr.bf16.mxu0 %v2323_v17  ;;  %v594_v16 = vld [vmem:[%s3319_s18 + $0x7e8] sm:$0xff]  ;;  %v297_v17 = vld [vmem:[#allocation2 + $0x1c0] sm:$0xff]  ;;  %v2469_v22 = vpack.c.bf16 %v587_v14, %v583_v12  ;;  %v296_v12 = vld [vmem:[#allocation2 + $0x1b8] sm:$0xff] }
  0xdc   : > { %744 = vmatmul.mubr.f32.gmra.mrb[20].mxu0 %v281_v25  ;;  %2452 = vmatprep.subr.bf16.mxu1 %v2451_v21  ;;  %v2341_v21 = vpack.c.bf16 %v585_v11, %v581_v10  ;;  %v2343_v23 = vpack.c.bf16 %v594_v16, %v590_v15  ;;  %v292_v10 = vld [vmem:[#allocation2 + $0x198] sm:$0xff]  ;;  %v291_v11 = vld [vmem:[#allocation2 + $0x190] sm:$0xff] }
  0xdd   : > { %1174 = vmatmul.mubr.f32.gmra.mrb[20].mxu1 %v281_v25  ;;  %749 = vmatprep.mubr.f32.mxu0 %v286_v28  ;;  %v593_v25 = vld [vmem:[%s3319_s18 + $0x7e0] sm:$0xff]  ;;  %v300_v14 = vld [vmem:[#allocation2 + $0x1d8] sm:$0xff]  ;;  %v299_v15 = vld [vmem:[#allocation2 + $0x1d0] sm:$0xff] }
  0xde   : > { %1179 = vmatprep.mubr.f32.mxu1 %v286_v28  ;;  %2326 = vmatpush1.bf16.msra.mxu0 %v2325_v29  ;;  %v595_v28 = vld [vmem:[%s3319_s18 + $0x7f0] sm:$0xff]  ;;  %v301_v29 = vld [vmem:[#allocation2 + $0x1e0] sm:$0xff]  ;;  %v304_v16 = vld [vmem:[#allocation2 + $0x1f8] sm:$0xff] }
  0xdf   : > { %2454 = vmatpush1.bf16.msra.mxu1 %v2453_v30  ;;  %2328 = vmatprep.subr.bf16.mxu0 %v2327_v31  ;;  %v306_v30 = vld [vmem:[#allocation2 + $0x208] sm:$0xff]  ;;  %v2345_v31 = vpack.c.bf16 %v593_v25, %v589_v24  ;;  %v2473_v32 = vpack.c.bf16 %v595_v28, %v591_v27  ;;  %v320_v24 = vld [vmem:[#allocation2 + $0x278] sm:$0xff]  ;;  %v319_v25 = vld [vmem:[#allocation2 + $0x270] sm:$0xff] }
  0xe0   : > { %750 = vmatmul.mubr.f32.gmra.mrb[22].mxu0 %v285_v39  ;;  %2456 = vmatprep.subr.bf16.mxu1 %v2455_v35  ;;  %v309_v35 = vld [vmem:[#allocation2 + $0x220] sm:$0xff]  ;;  %v323_v27 = vld [vmem:[#allocation2 + $0x290] sm:$0xff]  ;;  %v328_v28 = vld [vmem:[#allocation2 + $0x2b8] sm:$0xff] }
  0xe1   : > { %1180 = vmatmul.mubr.f32.gmra.mrb[22].mxu1 %v285_v39  ;;  %755 = vmatprep.mubr.f32.mxu0 %v290_v42  ;;  %v317_v39 = vld [vmem:[#allocation2 + $0x260] sm:$0xff] }
  0xe2   : > { %1185 = vmatprep.mubr.f32.mxu1 %v290_v42  ;;  %2330 = vmatpush1.bf16.msra.mxu0 %v2329_v43  ;;  %v326_v42 = vld [vmem:[#allocation2 + $0x2a8] sm:$0xff]  ;;  %v325_v43 = vld [vmem:[#allocation2 + $0x2a0] sm:$0xff] }
  0xe3   : > { %2458 = vmatpush1.bf16.msra.mxu1 %v2457_v44  ;;  %2332 = vmatprep.subr.bf16.mxu0 %v2331_v45  ;;  %v330_v44 = vld [vmem:[#allocation2 + $0x2c8] sm:$0xff]  ;;  %v329_v45 = vld [vmem:[#allocation2 + $0x2c0] sm:$0xff] }
  0xe4   : > { %756 = vmatmul.mubr.f32.gmra.mrb[24].mxu0 %v289_v53  ;;  %2460 = vmatprep.subr.bf16.mxu1 %v2459_v49  ;;  %v337_v49 = vld [vmem:[#allocation2 + $0x300] sm:$0xf] }
  0xe5   : > { %1186 = vmatmul.mubr.f32.gmra.mrb[24].mxu1 %v289_v53  ;;  %761 = vmatprep.mubr.f32.mxu0 %v294_v56  ;;  %v247_v53 = vld [vmem:[#allocation2 + $0x30] sm:$0xff] }
  0xe6   : > { %1191 = vmatprep.mubr.f32.mxu1 %v294_v56  ;;  %2334 = vmatpush1.bf16.msra.mxu0 %v2333_v57  ;;  %v256_v56 = vld [vmem:[#allocation2 + $0x78] sm:$0xff]  ;;  %v255_v57 = vld [vmem:[#allocation2 + $0x70] sm:$0xff] }
  0xe7   : > { %2462 = vmatpush1.bf16.msra.mxu1 %v2461_v58  ;;  %2336 = vmatprep.subr.bf16.mxu0 %v2335_v59  ;;  %v260_v58 = vld [vmem:[#allocation2 + $0x98] sm:$0xff]  ;;  %v259_v59 = vld [vmem:[#allocation2 + $0x90] sm:$0xff] }
  0xe8   : > { %762 = vmatmul.mubr.f32.gmra.mrb[26].mxu0 %v293_v3  ;;  %2464 = vmatprep.subr.bf16.mxu1 %v2463_v63  ;;  %v267_v63 = vld [vmem:[#allocation2 + $0xd0] sm:$0xff] }
  0xe9   : > { %1192 = vmatmul.mubr.f32.gmra.mrb[26].mxu1 %v293_v3  ;;  %767 = vmatprep.mubr.f32.mxu0 %v298_v6  ;;  %v275_v3 = vld [vmem:[#allocation2 + $0x110] sm:$0xff] }
  0xea   : > { %1197 = vmatprep.mubr.f32.mxu1 %v298_v6  ;;  %2338 = vmatpush1.bf16.msra.mxu0 %v2337_v7  ;;  %v284_v6 = vld [vmem:[#allocation2 + $0x158] sm:$0xff]  ;;  %v283_v7 = vld [vmem:[#allocation2 + $0x150] sm:$0xff] }
  0xeb   : > { %2466 = vmatpush1.bf16.msra.mxu1 %v2465_v8  ;;  %2340 = vmatprep.subr.bf16.mxu0 %v2339_v9  ;;  %v288_v8 = vld [vmem:[#allocation2 + $0x178] sm:$0xff]  ;;  %v287_v9 = vld [vmem:[#allocation2 + $0x170] sm:$0xff] }
  0xec   : > { %768 = vmatmul.mubr.f32.gmra.mrb[28].mxu0 %v297_v17  ;;  %2468 = vmatprep.subr.bf16.mxu1 %v2467_v13  ;;  %v295_v13 = vld [vmem:[#allocation2 + $0x1b0] sm:$0xff] }
  0xed   : > { %1198 = vmatmul.mubr.f32.gmra.mrb[28].mxu1 %v297_v17  ;;  %773 = vmatprep.mubr.f32.mxu0 %v302_v20  ;;  %v303_v17 = vld [vmem:[#allocation2 + $0x1f0] sm:$0xff] }
  0xee   : > { %1203 = vmatprep.mubr.f32.mxu1 %v302_v20  ;;  %2342 = vmatpush1.bf16.msra.mxu0 %v2341_v21  ;;  %v312_v20 = vld [vmem:[#allocation2 + $0x238] sm:$0xff]  ;;  %v311_v21 = vld [vmem:[#allocation2 + $0x230] sm:$0xff] }
  0xef   : > { %2470 = vmatpush1.bf16.msra.mxu1 %v2469_v22  ;;  %2344 = vmatprep.subr.bf16.mxu0 %v2343_v23  ;;  %v316_v22 = vld [vmem:[#allocation2 + $0x258] sm:$0xff]  ;;  %v315_v23 = vld [vmem:[#allocation2 + $0x250] sm:$0xff] }
  0xf0   : > { %774 = vmatmul.mubr.f32.gmra.mrb[30].mxu0 %v301_v29  ;;  %2472 = vmatprep.subr.bf16.mxu1 %v2471_v26  ;;  %v324_v26 = vld [vmem:[#allocation2 + $0x298] sm:$0xff] }
  0xf1   : > { %1204 = vmatmul.mubr.f32.gmra.mrb[30].mxu1 %v301_v29  ;;  %779 = vmatprep.mubr.f32.mxu0 %v306_v30  ;;  %v327_v29 = vld [vmem:[#allocation2 + $0x2b0] sm:$0xff] }
  0xf2   : > { %1209 = vmatprep.mubr.f32.mxu1 %v306_v30  ;;  %2346 = vmatpush1.bf16.msra.mxu0 %v2345_v31  ;;  %v332_v30 = vld [vmem:[#allocation2 + $0x2d8] sm:$0xff]  ;;  %v331_v31 = vld [vmem:[#allocation2 + $0x2d0] sm:$0xff] }
  0xf3   : > { %2474 = vmatpush1.bf16.msra.mxu1 %v2473_v32  ;;  %v336_v32 = vld [vmem:[#allocation2 + $0x2f8] sm:$0xff] }
  0xf4   : > { %780 = vmatmul.mubr.f32.gmra.mrb[32].mxu0 %v305_v33 }
  0xf5   : > { %1210 = vmatmul.mubr.f32.gmra.mrb[32].mxu1 %v305_v33  ;;  %785 = vmatprep.mubr.f32.mxu0 %v310_v34  ;;  %v335_v33 = vld [vmem:[#allocation2 + $0x2f0] sm:$0xff] }
  0xf6   : > { %1215 = vmatprep.mubr.f32.mxu1 %v310_v34  ;;  %v340_v34 = vld [vmem:[#allocation2 + $0x318] sm:$0xf] }
  0xf8   : > { %786 = vmatmul.mubr.f32.gmra.mrb[34].mxu0 %v309_v35 }
  0xf9   : > { %1216 = vmatmul.mubr.f32.gmra.mrb[34].mxu1 %v309_v35  ;;  %791 = vmatprep.mubr.f32.mxu0 %v314_v36  ;;  %v339_v35 = vld [vmem:[#allocation2 + $0x310] sm:$0xf] }
  0xfa   : > { %1221 = vmatprep.mubr.f32.mxu1 %v314_v36  ;;  %v599_v36 = vlaneseq }
  0xfc   : > { %792 = vmatmul.mubr.f32.gmra.mrb[36].mxu0 %v313_v37 }
  0xfd   : > { %1222 = vmatmul.mubr.f32.gmra.mrb[36].mxu1 %v313_v37  ;;  %797 = vmatprep.mubr.f32.mxu0 %v318_v38  ;;  %v600_v37 = vshrl.u32 %v599_v36, 7 }
  0xfe   : > { %1227 = vmatprep.mubr.f32.mxu1 %v318_v38 }
  0xff   : > { %v601_v38 = vsub.s32 0, %v600_v37 }
 0x100   : > { %798 = vmatmul.mubr.f32.gmra.mrb[38].mxu0 %v317_v39 }
 0x101   : > { %1228 = vmatmul.mubr.f32.gmra.mrb[38].mxu1 %v317_v39  ;;  %803 = vmatprep.mubr.f32.mxu0 %v322_v40  ;;  %v597_v39 = vld [vmem:[%s211_s25] sm:$0xf] }
 0x102   : > { %1233 = vmatprep.mubr.f32.mxu1 %v322_v40  ;;  %v609_v40 = vsub.s32 2, %v600_v37 }
 0x104   : > { %804 = vmatmul.mubr.f32.gmra.mrb[40].mxu0 %v321_v41 }
 0x105   : > { %1234 = vmatmul.mubr.f32.gmra.mrb[40].mxu1 %v321_v41  ;;  %809 = vmatprep.mubr.f32.mxu0 %v326_v42  ;;  %v605_v41 = vsub.s32 1, %v600_v37 }
 0x106   : > { %1239 = vmatprep.mubr.f32.mxu1 %v326_v42  ;;  %v613_v42 = vsub.s32 3, %v600_v37 }
 0x108   : > { %810 = vmatmul.mubr.f32.gmra.mrb[42].mxu0 %v325_v43 }
 0x109   : > { %1240 = vmatmul.mubr.f32.gmra.mrb[42].mxu1 %v325_v43  ;;  %815 = vmatprep.mubr.f32.mxu0 %v330_v44  ;;  %v3582_v43 = vrot.slane %v597_v39, %v601_v38 }
 0x10a   : > { %1245 = vmatprep.mubr.f32.mxu1 %v330_v44  ;;  %v3584_v44 = vrot.slane %v597_v39, %v609_v40 }
 0x10c   : > { %816 = vmatmul.mubr.f32.gmra.mrb[44].mxu0 %v329_v45 }
 0x10d   : > { %1246 = vmatmul.mubr.f32.gmra.mrb[44].mxu1 %v329_v45  ;;  %821 = vmatprep.mubr.f32.mxu0 %v334_v46  ;;  %v3586_v45 = vrot.slane %v597_v39, %v605_v41 }
 0x10e   : > { %1251 = vmatprep.mubr.f32.mxu1 %v334_v46  ;;  %v3588_v46 = vrot.slane %v597_v39, %v613_v42 }
 0x110   : > { %822 = vmatmul.mubr.f32.gmra.mrb[46].mxu0 %v333_v47 }
 0x111   : > { %1252 = vmatmul.mubr.f32.gmra.mrb[46].mxu1 %v333_v47  ;;  %827 = vmatprep.mubr.f32.mxu0 %v338_v48 }
 0x112   : > { %1257 = vmatprep.mubr.f32.mxu1 %v338_v48 }
 0x114   : > { %828 = vmatmul.mubr.f32.gmra.mrb[48].mxu0 %v337_v49 }
 0x115   : > { %1258 = vmatmul.mubr.f32.gmra.mrb[48].mxu1 %v337_v49  ;;  %898 = vmatprep.mubr.f32.mxu0 %v244_v50 }
 0x116   : > { %1328 = vmatprep.mubr.f32.mxu1 %v244_v50 }
 0x118   : > { %899 = vmatmul.mubr.f32.vlgmr.msra.gmra.mrb[0].mxu0 %v243_v51 }
 0x119   : > { %1329 = vmatmul.mubr.f32.vlgmr.msra.gmra.mrb[0].mxu1 %v243_v51  ;;  %904 = vmatprep.mubr.f32.mxu0 %v248_v52 }
 0x11a   : > { %1334 = vmatprep.mubr.f32.mxu1 %v248_v52 }
 0x11c   : > { %905 = vmatmul.mubr.f32.gmra.mrb[2].mxu0 %v247_v53 }
 0x11d   : > { %1335 = vmatmul.mubr.f32.gmra.mrb[2].mxu1 %v247_v53  ;;  %910 = vmatprep.mubr.f32.mxu0 %v252_v54 }
 0x11e   : > { %1340 = vmatprep.mubr.f32.mxu1 %v252_v54 }
 0x120   : > { %911 = vmatmul.mubr.f32.gmra.mrb[4].mxu0 %v251_v55 }
 0x121   : > { %1341 = vmatmul.mubr.f32.gmra.mrb[4].mxu1 %v251_v55  ;;  %916 = vmatprep.mubr.f32.mxu0 %v256_v56 }
 0x122   : > { %1346 = vmatprep.mubr.f32.mxu1 %v256_v56 }
 0x124   : > { %917 = vmatmul.mubr.f32.gmra.mrb[6].mxu0 %v255_v57 }
 0x125   : > { %1347 = vmatmul.mubr.f32.gmra.mrb[6].mxu1 %v255_v57  ;;  %922 = vmatprep.mubr.f32.mxu0 %v260_v58 }
 0x126   : > { %1352 = vmatprep.mubr.f32.mxu1 %v260_v58 }
 0x128   : > { %923 = vmatmul.mubr.f32.gmra.mrb[8].mxu0 %v259_v59 }
 0x129   : > { %1353 = vmatmul.mubr.f32.gmra.mrb[8].mxu1 %v259_v59  ;;  %928 = vmatprep.mubr.f32.mxu0 %v264_v60 }
 0x12a   : > { %1358 = vmatprep.mubr.f32.mxu1 %v264_v60 }
 0x12c   : > { %929 = vmatmul.mubr.f32.gmra.mrb[10].mxu0 %v263_v61 }
 0x12d   : > { %1359 = vmatmul.mubr.f32.gmra.mrb[10].mxu1 %v263_v61  ;;  %934 = vmatprep.mubr.f32.mxu0 %v268_v62 }
 0x12e   : > { %1364 = vmatprep.mubr.f32.mxu1 %v268_v62 }
 0x130   : > { %935 = vmatmul.mubr.f32.gmra.mrb[12].mxu0 %v267_v63 }
 0x131   : > { %1365 = vmatmul.mubr.f32.gmra.mrb[12].mxu1 %v267_v63  ;;  %940 = vmatprep.mubr.f32.mxu0 %v272_v0 }
 0x132   : > { %1370 = vmatprep.mubr.f32.mxu1 %v272_v0 }
 0x134   : > { %941 = vmatmul.mubr.f32.gmra.mrb[14].mxu0 %v271_v1 }
 0x135   : > { %1371 = vmatmul.mubr.f32.gmra.mrb[14].mxu1 %v271_v1  ;;  %946 = vmatprep.mubr.f32.mxu0 %v276_v2 }
 0x136   : > { %1376 = vmatprep.mubr.f32.mxu1 %v276_v2 }
 0x138   : > { %947 = vmatmul.mubr.f32.gmra.mrb[16].mxu0 %v275_v3 }
 0x139   : > { %1377 = vmatmul.mubr.f32.gmra.mrb[16].mxu1 %v275_v3  ;;  %952 = vmatprep.mubr.f32.mxu0 %v280_v4 }
 0x13a   : > { %1382 = vmatprep.mubr.f32.mxu1 %v280_v4 }
 0x13c   : > { %953 = vmatmul.mubr.f32.gmra.mrb[18].mxu0 %v279_v5 }
 0x13d   : > { %1383 = vmatmul.mubr.f32.gmra.mrb[18].mxu1 %v279_v5  ;;  %958 = vmatprep.mubr.f32.mxu0 %v284_v6 }
 0x13e   : > { %1388 = vmatprep.mubr.f32.mxu1 %v284_v6 }
 0x140   : > { %959 = vmatmul.mubr.f32.gmra.mrb[20].mxu0 %v283_v7 }
 0x141   : > { %1389 = vmatmul.mubr.f32.gmra.mrb[20].mxu1 %v283_v7  ;;  %964 = vmatprep.mubr.f32.mxu0 %v288_v8 }
 0x142   : > { %1394 = vmatprep.mubr.f32.mxu1 %v288_v8 }
 0x144   : > { %965 = vmatmul.mubr.f32.gmra.mrb[22].mxu0 %v287_v9 }
 0x145   : > { %1395 = vmatmul.mubr.f32.gmra.mrb[22].mxu1 %v287_v9  ;;  %970 = vmatprep.mubr.f32.mxu0 %v292_v10 }
 0x146   : > { %1400 = vmatprep.mubr.f32.mxu1 %v292_v10 }
 0x148   : > { %971 = vmatmul.mubr.f32.gmra.mrb[24].mxu0 %v291_v11 }
 0x149   : > { %1401 = vmatmul.mubr.f32.gmra.mrb[24].mxu1 %v291_v11  ;;  %976 = vmatprep.mubr.f32.mxu0 %v296_v12 }
 0x14a   : > { %1406 = vmatprep.mubr.f32.mxu1 %v296_v12 }
 0x14c   : > { %977 = vmatmul.mubr.f32.gmra.mrb[26].mxu0 %v295_v13 }
 0x14d   : > { %1407 = vmatmul.mubr.f32.gmra.mrb[26].mxu1 %v295_v13  ;;  %982 = vmatprep.mubr.f32.mxu0 %v300_v14 }
 0x14e   : > { %1412 = vmatprep.mubr.f32.mxu1 %v300_v14 }
 0x150   : > { %983 = vmatmul.mubr.f32.gmra.mrb[28].mxu0 %v299_v15 }
 0x151   : > { %1413 = vmatmul.mubr.f32.gmra.mrb[28].mxu1 %v299_v15  ;;  %988 = vmatprep.mubr.f32.mxu0 %v304_v16 }
 0x152   : > { %1418 = vmatprep.mubr.f32.mxu1 %v304_v16 }
 0x154   : > { %989 = vmatmul.mubr.f32.gmra.mrb[30].mxu0 %v303_v17 }
 0x155   : > { %1419 = vmatmul.mubr.f32.gmra.mrb[30].mxu1 %v303_v17  ;;  %994 = vmatprep.mubr.f32.mxu0 %v308_v18 }
 0x156   : > { %1424 = vmatprep.mubr.f32.mxu1 %v308_v18 }
 0x158   : > { %995 = vmatmul.mubr.f32.gmra.mrb[32].mxu0 %v307_v19 }
 0x159   : > { %1425 = vmatmul.mubr.f32.gmra.mrb[32].mxu1 %v307_v19  ;;  %1000 = vmatprep.mubr.f32.mxu0 %v312_v20 }
 0x15a   : > { %1430 = vmatprep.mubr.f32.mxu1 %v312_v20 }
 0x15c   : > { %1001 = vmatmul.mubr.f32.gmra.mrb[34].mxu0 %v311_v21 }
 0x15d   : > { %1431 = vmatmul.mubr.f32.gmra.mrb[34].mxu1 %v311_v21  ;;  %1006 = vmatprep.mubr.f32.mxu0 %v316_v22 }
 0x15e   : > { %1436 = vmatprep.mubr.f32.mxu1 %v316_v22 }
 0x160   : > { %1007 = vmatmul.mubr.f32.gmra.mrb[36].mxu0 %v315_v23 }
 0x161   : > { %1437 = vmatmul.mubr.f32.gmra.mrb[36].mxu1 %v315_v23  ;;  %1012 = vmatprep.mubr.f32.mxu0 %v320_v24 }
 0x162   : > { %1442 = vmatprep.mubr.f32.mxu1 %v320_v24 }
 0x164   : > { %1013 = vmatmul.mubr.f32.gmra.mrb[38].mxu0 %v319_v25 }
 0x165   : > { %1443 = vmatmul.mubr.f32.gmra.mrb[38].mxu1 %v319_v25  ;;  %1018 = vmatprep.mubr.f32.mxu0 %v324_v26 }
 0x166   : > { %1448 = vmatprep.mubr.f32.mxu1 %v324_v26 }
 0x168   : > { %1019 = vmatmul.mubr.f32.gmra.mrb[40].mxu0 %v323_v27 }
 0x169   : > { %1449 = vmatmul.mubr.f32.gmra.mrb[40].mxu1 %v323_v27  ;;  %1024 = vmatprep.mubr.f32.mxu0 %v328_v28 }
 0x16a   : > { %1454 = vmatprep.mubr.f32.mxu1 %v328_v28 }
 0x16c   : > { %1025 = vmatmul.mubr.f32.gmra.mrb[42].mxu0 %v327_v29 }
 0x16d   : > { %1455 = vmatmul.mubr.f32.gmra.mrb[42].mxu1 %v327_v29  ;;  %1030 = vmatprep.mubr.f32.mxu0 %v332_v30 }
 0x16e   : > { %1460 = vmatprep.mubr.f32.mxu1 %v332_v30 }
 0x170   : > { %1031 = vmatmul.mubr.f32.gmra.mrb[44].mxu0 %v331_v31 }
 0x171   : > { %1461 = vmatmul.mubr.f32.gmra.mrb[44].mxu1 %v331_v31  ;;  %1036 = vmatprep.mubr.f32.mxu0 %v336_v32 }
 0x172   : > { %1466 = vmatprep.mubr.f32.mxu1 %v336_v32 }
 0x174   : > { %1037 = vmatmul.mubr.f32.gmra.mrb[46].mxu0 %v335_v33 }
 0x175   : > { %1467 = vmatmul.mubr.f32.gmra.mrb[46].mxu1 %v335_v33  ;;  %1042 = vmatprep.mubr.f32.mxu0 %v340_v34 }
 0x176   : > { %1472 = vmatprep.mubr.f32.mxu1 %v340_v34 }
 0x178   : > { %1043 = vmatmul.mubr.f32.gmra.mrb[48].mxu0 %v339_v35 }
 0x179   : > { %1473 = vmatmul.mubr.f32.gmra.mrb[48].mxu1 %v339_v35 }
 0x1eb   : > { %v900_v47 = vpop.f32.mrb[0].mxu0 }
 0x1ec   : > { %v2475_v48 = vadd.f32 %v900_v47, %v3582_v43  ;;  %v1330_v49 = vpop.f32.mrb[0].mxu1  ;;  %v902_v50 = vpop.f32.mrb[1].mxu0 }
 0x1ed   : > { %v2525_v51 = vadd.f32 %v1330_v49, %v3584_v44  ;;  %v2476_v52 = vadd.f32 %v902_v50, %v3586_v45  ;;  %v1332_v53 = vpop.f32.mrb[1].mxu1 }
 0x1ee   : > { %v1579_v54 = vmul.f32 0.70710677, %v2475_v48  ;;  %v2526_v55 = vadd.f32 %v1332_v53, %v3588_v46  ;;  %v1479_v14 = vmul.f32 0.5, %v2475_v48 }
 0x1ef   : > { %v1581_v56 = vmul.f32 0.70710677, %v2525_v51  ;;  %v1580_v57 = vmul.f32 0.70710677, %v2476_v52  ;;  %v906_v59 = vpop.f32.mrb[2].mxu0  ;;  %v1481_v18 = vmul.f32 0.5, %v2525_v51 }
 0x1f0   : > { %2743 = verf.f32 %v1579_v54  ;;  %v1582_v58 = vmul.f32 0.70710677, %v2526_v55  ;;  %v1336_v60 = vpop.f32.mrb[2].mxu1  ;;  %v2477_v61 = vadd.f32 %v906_v59, %v3582_v43  ;;  %v908_v63 = vpop.f32.mrb[3].mxu0  ;;  %v1480_v19 = vmul.f32 0.5, %v2476_v52 }
 0x1f1   : > { %2745 = verf.f32 %v1581_v56  ;;  %v2527_v62 = vadd.f32 %v1336_v60, %v3584_v44  ;;  %v1338_v0 = vpop.f32.mrb[3].mxu1  ;;  %v2478_v1 = vadd.f32 %v908_v63, %v3586_v45  ;;  %v1482_v23 = vmul.f32 0.5, %v2526_v55 }
 0x1f2   : > { %2747 = verf.f32 %v1580_v57  ;;  %v2528_v2 = vadd.f32 %v1338_v0, %v3588_v46  ;;  %v1583_v3 = vmul.f32 0.70710677, %v2477_v61  ;;  %v1483_v28 = vmul.f32 0.5, %v2477_v61 }
 0x1f3   : > { %2749 = verf.f32 %v1582_v58  ;;  %v912_v4 = vpop.f32.mrb[4].mxu0  ;;  %v1585_v5 = vmul.f32 0.70710677, %v2527_v62  ;;  %v1584_v6 = vmul.f32 0.70710677, %v2478_v1  ;;  %v1485_v33 = vmul.f32 0.5, %v2527_v62 }
 0x1f4   : > { %2751 = verf.f32 %v1583_v3  ;;  %v1586_v7 = vmul.f32 0.70710677, %v2528_v2  ;;  %v2479_v8 = vadd.f32 %v912_v4, %v3582_v43  ;;  %v1342_v9 = vpop.f32.mrb[4].mxu1  ;;  %v914_v10 = vpop.f32.mrb[5].mxu0  ;;  %v1484_v49 = vmul.f32 0.5, %v2478_v1 }
 0x1f5   : > { %2753 = verf.f32 %v1585_v5  ;;  %v3600_v11 = vadd.f32 %v1342_v9, %v3584_v44  ;;  %v3603_v12 = vadd.f32 %v914_v10, %v3586_v45  ;;  %v1344_v13 = vpop.f32.mrb[5].mxu1  ;;  %v1486_v54 = vmul.f32 0.5, %v2528_v2 }
 0x1f6   : > { %2755 = verf.f32 %v1584_v6  ;;  %v1587_v15 = vmul.f32 0.70710677, %v2479_v8  ;;  %v3607_v16 = vadd.f32 %v1344_v13, %v3588_v46  ;;  %v1487_v57 = vmul.f32 0.5, %v2479_v8 }
 0x1f7   : > { %v918_v17 = vpop.f32.mrb[6].mxu0  ;;  %2757 = verf.f32 %v1586_v7  ;;  %v1589_v20 = vmul.f32 0.70710677, %v3600_v11  ;;  %v1588_v24 = vmul.f32 0.70710677, %v3603_v12  ;;  %v1489_v13 = vmul.f32 0.5, %v3600_v11 }
 0x1f8   : > { %v1348_v21 = vpop.f32.mrb[6].mxu1  ;;  %v920_v22 = vpop.f32.mrb[7].mxu0  ;;  %2759 = verf.f32 %v1587_v15  ;;  %v1590_v25 = vmul.f32 0.70710677, %v3607_v16  ;;  %v3613_v29 = vadd.f32 %v918_v17, %v3582_v43 }
 0x1f9   : > { %v1350_v26 = vpop.f32.mrb[7].mxu1  ;;  %2761 = verf.f32 %v1589_v20  ;;  %v3616_v30 = vadd.f32 %v1348_v21, %v3584_v44  ;;  %v3619_v34 = vadd.f32 %v920_v22, %v3586_v45 }
 0x1fa   : > { %v2744_v27 = vpop.eup %2743  ;;  %2763 = verf.f32 %v1588_v24  ;;  %v1591_v38 = vmul.f32 0.70710677, %v3613_v29  ;;  %v3623_v39 = vadd.f32 %v1350_v26, %v3588_v46  ;;  %v1490_v24 = vmul.f32 0.5, %v3607_v16 }
 0x1fb   : > { %v2746_v31 = vpop.eup %2745  ;;  %v1779_v32 = vadd.f32 1.0, %v2744_v27  ;;  %v924_v35 = vpop.f32.mrb[8].mxu0  ;;  %2765 = verf.f32 %v1590_v25  ;;  %v1593_v50 = vmul.f32 0.70710677, %v3616_v30  ;;  %v1592_v58 = vmul.f32 0.70710677, %v3619_v34 }
 0x1fc   : > { %v2748_v36 = vpop.eup %2747  ;;  %v1781_v37 = vadd.f32 1.0, %v2746_v31  ;;  %v1354_v40 = vpop.f32.mrb[8].mxu1  ;;  %2767 = verf.f32 %v1591_v38  ;;  %v1594_v63 = vmul.f32 0.70710677, %v3623_v39  ;;  %v3635_v0 = vadd.f32 %v924_v35, %v3582_v43 }
 0x1fd   : > { %v926_v41 = vpop.f32.mrb[9].mxu0  ;;  %v2750_v42 = vpop.eup %2749  ;;  %v1879_v47 = vmul.f32 %v1779_v32, %v1479_v14  ;;  %v1780_v48 = vadd.f32 1.0, %v2748_v36  ;;  %2769 = verf.f32 %v1593_v50  ;;  %v3641_v5 = vadd.f32 %v1354_v40, %v3584_v44 }
 0x1fe   : > { %v1356_v51 = vpop.f32.mrb[9].mxu1  ;;  %v1881_v52 = vmul.f32 %v1781_v37, %v1481_v18  ;;  %v1782_v53 = vadd.f32 1.0, %v2750_v42  ;;  %v2752_v55 = vpop.eup %2751  ;;  %2771 = verf.f32 %v1592_v58  ;;  %v3644_v6 = vadd.f32 %v926_v41, %v3586_v45 }
 0x1ff   : > { %1979 = vst [vmem:[%s3628_s6] sm:$0xff] %v1879_v47  ;;  %v1880_v56 = vmul.f32 %v1780_v48, %v1480_v19  ;;  %v930_v59 = vpop.f32.mrb[10].mxu0  ;;  %v2754_v60 = vpop.eup %2753  ;;  %v1783_v62 = vadd.f32 1.0, %v2752_v55  ;;  %2773 = verf.f32 %v1594_v63  ;;  %v1488_v18 = vmul.f32 0.5, %v3603_v12 }
 0x200   : > { %1981 = vst [vmem:[%s3628_s6 + $0x10] sm:$0xff] %v1881_v52  ;;  %v1882_v61 = vmul.f32 %v1782_v53, %v1482_v23  ;;  %v1360_v1 = vpop.f32.mrb[10].mxu1  ;;  %v3637_v2 = vpop.f32.mrb[11].mxu0  ;;  %v1785_v4 = vadd.f32 1.0, %v2754_v60  ;;  %v1595_v19 = vmul.f32 0.70710677, %v3635_v0  ;;  %v3665_v36 = vadd.f32 %v1356_v51, %v3588_v46 }
 0x201   : > { %v2756_v3 = vpop.eup %2755  ;;  %1980 = vst [vmem:[%s3628_s6 + $0x8] sm:$0xff] %v1880_v56  ;;  %v3646_v7 = vpop.f32.mrb[11].mxu1  ;;  %v1883_v9 = vmul.f32 %v1783_v62, %v1483_v28  ;;  %v1597_v25 = vmul.f32 0.70710677, %v3641_v5  ;;  %v1596_v31 = vmul.f32 0.70710677, %v3644_v6  ;;  %v3669_v40 = vadd.f32 %v930_v59, %v3582_v43 }
 0x202   : > { %v2758_v8 = vpop.eup %2757  ;;  %1982 = vst [vmem:[%s3628_s6 + $0x18] sm:$0xff] %v1882_v61  ;;  %v1784_v10 = vadd.f32 1.0, %v2756_v3  ;;  %v1885_v15 = vmul.f32 %v1785_v4, %v1485_v33  ;;  %2775 = verf.f32 %v1595_v19  ;;  %v1491_v48 = vmul.f32 0.5, %v3613_v29 }
 0x203   : > { %v2760_v14 = vpop.eup %2759  ;;  %v1786_v17 = vadd.f32 1.0, %v2758_v8  ;;  %v936_v20 = vpop.f32.mrb[12].mxu0  ;;  %1983 = vst [vmem:[%s3628_s6 + $0x20] sm:$0xff] %v1883_v9  ;;  %2777 = verf.f32 %v1597_v25  ;;  %v3675_v50 = vadd.f32 %v1360_v1, %v3584_v44  ;;  %v1493_v56 = vmul.f32 0.5, %v3616_v30 }
 0x204   : > { %v2762_v21 = vpop.eup %2761  ;;  %v1884_v22 = vmul.f32 %v1784_v10, %v1484_v49  ;;  %v1787_v23 = vadd.f32 1.0, %v2760_v14  ;;  %v3655_v11 = vpop.f32.mrb[12].mxu1  ;;  %1985 = vst [vmem:[%s3628_s6 + $0x30] sm:$0xff] %v1885_v15  ;;  %2779 = verf.f32 %v1596_v31  ;;  %v1598_v49 = vmul.f32 0.70710677, %v3665_v36 }
 0x205   : > { %v3657_v26 = vpop.f32.mrb[13].mxu0  ;;  %v2764_v27 = vpop.eup %2763  ;;  %v1886_v12 = vmul.f32 %v1786_v17, %v1486_v54  ;;  %v1789_v28 = vadd.f32 1.0, %v2762_v21  ;;  %v1492_v59 = vmul.f32 0.5, %v3619_v34  ;;  %v1601_v60 = vmul.f32 0.70710677, %v3675_v50 }
 0x206   : > { %v3661_v32 = vpop.f32.mrb[13].mxu1  ;;  %v2766_v33 = vpop.eup %2765  ;;  %1984 = vst [vmem:[%s3628_s6 + $0x28] sm:$0xff] %v1884_v22  ;;  %v1887_v16 = vmul.f32 %v1787_v23, %v1487_v57  ;;  %v1788_v35 = vadd.f32 1.0, %v2764_v27  ;;  %v1599_v57 = vmul.f32 0.70710677, %v3669_v40  ;;  %2781 = verf.f32 %v1598_v49 }
 0x207   : > { %1986 = vst [vmem:[%s3628_s6 + $0x38] sm:$0xff] %v1886_v12  ;;  %v1889_v37 = vmul.f32 %v1789_v28, %v1489_v13  ;;  %v1790_v38 = vadd.f32 1.0, %v2766_v33  ;;  %v942_v41 = vpop.f32.mrb[14].mxu0  ;;  %v2768_v42 = vpop.eup %2767  ;;  %v3692_v30 = vadd.f32 %v3637_v2, %v3586_v45  ;;  %v3696_v63 = vadd.f32 %v3646_v7, %v3588_v46 }
 0x208   : > { %1987 = vst [vmem:[%s3628_s6 + $0x40] sm:$0xff] %v1887_v16  ;;  %v1888_v47 = vmul.f32 %v1788_v35, %v1488_v18  ;;  %v3677_v51 = vpop.f32.mrb[14].mxu1  ;;  %v3679_v52 = vpop.f32.mrb[15].mxu0  ;;  %v1791_v55 = vadd.f32 1.0, %v2768_v42  ;;  %2783 = verf.f32 %v1599_v57  ;;  %v3701_v8 = vadd.f32 %v936_v20, %v3582_v43 }
 0x209   : > { %v2770_v53 = vpop.eup %2769  ;;  %1989 = vst [vmem:[%s3628_s6 + $0x50] sm:$0xff] %v1889_v37  ;;  %v1890_v54 = vmul.f32 %v1790_v38, %v1490_v24  ;;  %v3684_v58 = vpop.f32.mrb[15].mxu1  ;;  %2785 = verf.f32 %v1601_v60  ;;  %v1494_v2 = vmul.f32 0.5, %v3623_v39  ;;  %v1600_v7 = vmul.f32 0.70710677, %v3692_v30 }
 0x20a   : > { %1988 = vst [vmem:[%s3628_s6 + $0x48] sm:$0xff] %v1888_v47  ;;  %v1793_v29 = vadd.f32 1.0, %v2770_v53  ;;  %v2772_v61 = vpop.eup %2771  ;;  %v1891_v62 = vmul.f32 %v1791_v55, %v1491_v48  ;;  %v1495_v17 = vmul.f32 0.5, %v3635_v0  ;;  %v1602_v18 = vmul.f32 0.70710677, %v3696_v63 }
 0x20b   : > { %1990 = vst [vmem:[%s3628_s6 + $0x58] sm:$0xff] %v1890_v54  ;;  %v3698_v1 = vpop.f32.mrb[16].mxu0  ;;  %v2774_v34 = vpop.eup %2773  ;;  %v1792_v4 = vadd.f32 1.0, %v2772_v61  ;;  %v1603_v19 = vmul.f32 0.70710677, %v3701_v8  ;;  %2787 = verf.f32 %v1600_v7  ;;  %v3718_v39 = vadd.f32 %v3655_v11, %v3584_v44 }
 0x20c   : > { %v1893_v3 = vmul.f32 %v1793_v29, %v1493_v56  ;;  %v3703_v9 = vpop.f32.mrb[16].mxu1  ;;  %v3705_v10 = vpop.f32.mrb[17].mxu0  ;;  %1991 = vst [vmem:[%s3628_s6 + $0x60] sm:$0xff] %v1891_v62  ;;  %v1794_v13 = vadd.f32 1.0, %v2774_v34  ;;  %v3722_v22 = vadd.f32 %v3657_v26, %v3586_v45  ;;  %2789 = verf.f32 %v1602_v18 }
 0x20d   : > { %v3710_v14 = vpop.f32.mrb[17].mxu1  ;;  %v1892_v15 = vmul.f32 %v1792_v4, %v1492_v59  ;;  %v2776_v20 = vpop.eup %2775  ;;  %v3729_v25 = vadd.f32 %v3661_v32, %v3588_v46  ;;  %v3732_v27 = vadd.f32 %v942_v41, %v3582_v43  ;;  %v1497_v26 = vmul.f32 0.5, %v3641_v5 }
 0x20e   : > { %1993 = vst [vmem:[%s3628_s6 + $0x70] sm:$0xff] %v1893_v3  ;;  %v1894_v21 = vmul.f32 %v1794_v13, %v1494_v2  ;;  %v2778_v24 = vpop.eup %2777  ;;  %v1795_v0 = vadd.f32 1.0, %v2776_v20  ;;  %2791 = verf.f32 %v1603_v19  ;;  %v1605_v33 = vmul.f32 0.70710677, %v3718_v39 }
 0x20f   : > { %v3724_v23 = vpop.f32.mrb[18].mxu0  ;;  %1992 = vst [vmem:[%s3628_s6 + $0x68] sm:$0xff] %v1892_v15  ;;  %v2780_v28 = vpop.eup %2779  ;;  %v1797_v31 = vadd.f32 1.0, %v2778_v24  ;;  %v1496_v35 = vmul.f32 0.5, %v3644_v6  ;;  %v1604_v38 = vmul.f32 0.70710677, %v3722_v22  ;;  %v3759_v57 = vadd.f32 %v3677_v51, %v3584_v44 }
 0x210   : > { %v3734_v12 = vpop.f32.mrb[18].mxu1  ;;  %v3736_v11 = vpop.f32.mrb[19].mxu0  ;;  %1994 = vst [vmem:[%s3628_s6 + $0x78] sm:$0xff] %v1894_v21  ;;  %v1895_v32 = vmul.f32 %v1795_v0, %v1495_v17  ;;  %v1796_v37 = vadd.f32 1.0, %v2780_v28  ;;  %v1498_v42 = vmul.f32 0.5, %v3665_v36  ;;  %2793 = verf.f32 %v1605_v33 }
 0x211   : > { %v3741_v16 = vpop.f32.mrb[19].mxu1  ;;  %v1897_v41 = vmul.f32 %v1797_v31, %v1497_v26  ;;  %v1606_v47 = vmul.f32 0.70710677, %v3729_v25  ;;  %v2782_v48 = vpop.eup %2781  ;;  %v1499_v53 = vmul.f32 0.5, %v3669_v40  ;;  %2795 = verf.f32 %v1604_v38 }
 0x212   : > { %1995 = vst [vmem:[%s3628_s6 + $0x80] sm:$0xff] %v1895_v32  ;;  %v1896_v49 = vmul.f32 %v1796_v37, %v1496_v35  ;;  %v1607_v6 = vmul.f32 0.70710677, %v3732_v27  ;;  %v2784_v56 = vpop.eup %2783  ;;  %v1798_v36 = vadd.f32 1.0, %v2782_v48  ;;  %v3763_v29 = vadd.f32 %v3679_v52, %v3586_v45 }
 0x213   : > { %v3747_v5 = vpop.f32.mrb[20].mxu0  ;;  %1997 = vst [vmem:[%s3628_s6 + $0x90] sm:$0xff] %v1897_v41  ;;  %2797 = verf.f32 %v1606_v47  ;;  %v2786_v59 = vpop.eup %2785  ;;  %v1799_v60 = vadd.f32 1.0, %v2784_v56  ;;  %v3770_v61 = vadd.f32 %v3684_v58, %v3588_v46  ;;  %v3774_v62 = vadd.f32 %v3698_v1, %v3582_v43 }
 0x214   : > { %v3752_v54 = vpop.f32.mrb[20].mxu1  ;;  %v3754_v55 = vpop.f32.mrb[21].mxu0  ;;  %1996 = vst [vmem:[%s3628_s6 + $0x88] sm:$0xff] %v1896_v49  ;;  %2799 = verf.f32 %v1607_v6  ;;  %v1898_v51 = vmul.f32 %v1798_v36, %v1498_v42  ;;  %v1501_v34 = vmul.f32 0.5, %v3675_v50  ;;  %v1801_v52 = vadd.f32 1.0, %v2786_v59 }
 0x215   : > { %v3765_v40 = vpop.f32.mrb[21].mxu1  ;;  %v1609_v3 = vmul.f32 0.70710677, %v3759_v57  ;;  %v1899_v2 = vmul.f32 %v1799_v60, %v1499_v53  ;;  %v1500_v13 = vmul.f32 0.5, %v3692_v30  ;;  %v1502_v7 = vmul.f32 0.5, %v3696_v63  ;;  %v2788_v17 = vpop.eup %2787 }
 0x216   : > { %v1608_v58 = vmul.f32 0.70710677, %v3763_v29  ;;  %1998 = vst [vmem:[%s3628_s6 + $0x98] sm:$0xff] %v1898_v51  ;;  %v1901_v50 = vmul.f32 %v1801_v52, %v1501_v34  ;;  %v1503_v18 = vmul.f32 0.5, %v3701_v8  ;;  %v1610_v19 = vmul.f32 0.70710677, %v3770_v61  ;;  %v2790_v30 = vpop.eup %2789 }
 0x217   : > { %v3778_v4 = vpop.f32.mrb[22].mxu0  ;;  %2801 = verf.f32 %v1609_v3  ;;  %1999 = vst [vmem:[%s3628_s6 + $0xa0] sm:$0xff] %v1899_v2  ;;  %v1800_v63 = vadd.f32 1.0, %v2788_v17  ;;  %v1611_v21 = vmul.f32 0.70710677, %v3774_v62  ;;  %v3796_v24 = vadd.f32 %v3703_v9, %v3584_v44 }
 0x218   : > { %v3783_v15 = vpop.f32.mrb[22].mxu1  ;;  %v3785_v1 = vpop.f32.mrb[23].mxu0  ;;  %2803 = verf.f32 %v1608_v58  ;;  %2001 = vst [vmem:[%s3628_s6 + $0xb0] sm:$0xff] %v1901_v50  ;;  %v1802_v28 = vadd.f32 1.0, %v2790_v30  ;;  %v3801_v8 = vadd.f32 %v3705_v10, %v3586_v45  ;;  %v3805_v26 = vadd.f32 %v3710_v14, %v3588_v46 }
 0x219   : > { %v3790_v20 = vpop.f32.mrb[23].mxu1  ;;  %v2792_v0 = vpop.eup %2791  ;;  %2805 = verf.f32 %v1610_v19  ;;  %v1900_v33 = vmul.f32 %v1800_v63, %v1500_v13  ;;  %v1505_v9 = vmul.f32 0.5, %v3718_v39  ;;  %v1504_v41 = vmul.f32 0.5, %v3722_v22 }
 0x21a   : > { %v1803_v32 = vadd.f32 1.0, %v2792_v0  ;;  %2807 = verf.f32 %v1611_v21  ;;  %v2794_v38 = vpop.eup %2793  ;;  %v1902_v10 = vmul.f32 %v1802_v28, %v1502_v7  ;;  %v1613_v42 = vmul.f32 0.70710677, %v3796_v24 }
 0x21b   : > { %v3807_v31 = vpop.f32.mrb[24].mxu0  ;;  %v1612_v14 = vmul.f32 0.70710677, %v3801_v8  ;;  %v2796_v48 = vpop.eup %2795  ;;  %2000 = vst [vmem:[%s3628_s6 + $0xa8] sm:$0xff] %v1900_v33  ;;  %v1805_v49 = vadd.f32 1.0, %v2794_v38  ;;  %v1506_v53 = vmul.f32 0.5, %v3729_v25  ;;  %v3825_v22 = vadd.f32 %v3724_v23, %v3582_v43 }
 0x21c   : > { %v3810_v35 = vpop.f32.mrb[24].mxu1  ;;  %v3812_v37 = vpop.f32.mrb[25].mxu0  ;;  %v1903_v39 = vmul.f32 %v1803_v32, %v1503_v18  ;;  %v1614_v6 = vmul.f32 0.70710677, %v3805_v26  ;;  %2002 = vst [vmem:[%s3628_s6 + $0xb8] sm:$0xff] %v1902_v10  ;;  %v1804_v36 = vadd.f32 1.0, %v2796_v48  ;;  %2809 = verf.f32 %v1613_v42 }
 0x21d   : > { %v3817_v47 = vpop.f32.mrb[25].mxu1  ;;  %v2798_v56 = vpop.eup %2797  ;;  %v3829_v59 = vadd.f32 %v3734_v12, %v3584_v44  ;;  %v1905_v25 = vmul.f32 %v1805_v49, %v1505_v9  ;;  %2811 = verf.f32 %v1612_v14  ;;  %v3836_v52 = vadd.f32 %v3736_v11, %v3586_v45 }
 0x21e   : > { %v2800_v51 = vpop.eup %2799  ;;  %2003 = vst [vmem:[%s3628_s6 + $0xc0] sm:$0xff] %v1903_v39  ;;  %v1806_v34 = vadd.f32 1.0, %v2798_v56  ;;  %v1904_v2 = vmul.f32 %v1804_v36, %v1504_v41  ;;  %v1507_v12 = vmul.f32 0.5, %v3732_v27  ;;  %2813 = verf.f32 %v1614_v6 }
 0x21f   : > { %v3831_v60 = vpop.f32.mrb[26].mxu0  ;;  %v1807_v13 = vadd.f32 1.0, %v2800_v51  ;;  %2005 = vst [vmem:[%s3628_s6 + $0xd0] sm:$0xff] %v1905_v25  ;;  %v1509_v17 = vmul.f32 0.5, %v3759_v57  ;;  %v1615_v50 = vmul.f32 0.70710677, %v3825_v22  ;;  %v3854_v63 = vadd.f32 %v3741_v16, %v3588_v46 }
 0x220   : > { %v3838_v3 = vpop.f32.mrb[26].mxu1  ;;  %v3840_v23 = vpop.f32.mrb[27].mxu0  ;;  %v1906_v58 = vmul.f32 %v1806_v34, %v1506_v53  ;;  %v1617_v11 = vmul.f32 0.70710677, %v3829_v59  ;;  %2004 = vst [vmem:[%s3628_s6 + $0xc8] sm:$0xff] %v1904_v2  ;;  %v1508_v30 = vmul.f32 0.5, %v3763_v29  ;;  %v3861_v28 = vadd.f32 %v3747_v5, %v3582_v43 }
 0x221   : > { %v3843_v7 = vpop.f32.mrb[27].mxu1  ;;  %v2802_v18 = vpop.eup %2801  ;;  %v1907_v19 = vmul.f32 %v1807_v13, %v1507_v12  ;;  %v1616_v27 = vmul.f32 0.70710677, %v3836_v52  ;;  %2815 = verf.f32 %v1615_v50  ;;  %v3865_v33 = vadd.f32 %v3752_v54, %v3584_v44 }
 0x222   : > { %v2804_v0 = vpop.eup %2803  ;;  %2006 = vst [vmem:[%s3628_s6 + $0xd8] sm:$0xff] %v1906_v58  ;;  %v1809_v57 = vadd.f32 1.0, %v2802_v18  ;;  %v1510_v38 = vmul.f32 0.5, %v3770_v61  ;;  %2817 = verf.f32 %v1617_v11  ;;  %v1618_v10 = vmul.f32 0.70710677, %v3854_v63 }
 0x223   : > { %v3856_v21 = vpop.f32.mrb[28].mxu0  ;;  %v2806_v16 = vpop.eup %2805  ;;  %2007 = vst [vmem:[%s3628_s6 + $0xe0] sm:$0xff] %v1907_v19  ;;  %v1808_v9 = vadd.f32 1.0, %v2804_v0  ;;  %v1511_v54 = vmul.f32 0.5, %v3774_v62  ;;  %2819 = verf.f32 %v1616_v27  ;;  %v1619_v49 = vmul.f32 0.70710677, %v3861_v28 }
 0x224   : > { %v3867_v29 = vpop.f32.mrb[28].mxu1  ;;  %v3869_v32 = vpop.f32.mrb[29].mxu0  ;;  %v1909_v42 = vmul.f32 %v1809_v57, %v1509_v17  ;;  %v1810_v14 = vadd.f32 1.0, %v2806_v16  ;;  %2821 = verf.f32 %v1618_v10  ;;  %v1513_v6 = vmul.f32 0.5, %v3796_v24 }
 0x225   : > { %v3874_v41 = vpop.f32.mrb[29].mxu1  ;;  %v2808_v5 = vpop.eup %2807  ;;  %v1908_v48 = vmul.f32 %v1808_v9, %v1508_v30  ;;  %v1621_v56 = vmul.f32 0.70710677, %v3865_v33  ;;  %v3885_v36 = vadd.f32 %v3754_v55, %v3586_v45  ;;  %2823 = verf.f32 %v1619_v49 }
 0x226   : > { %v1811_v39 = vadd.f32 1.0, %v2808_v5  ;;  %2009 = vst [vmem:[%s3628_s6 + $0xf0] sm:$0xff] %v1909_v42  ;;  %v1910_v61 = vmul.f32 %v1810_v14, %v1510_v38  ;;  %v2810_v25 = vpop.eup %2809  ;;  %v3894_v2 = vadd.f32 %v3765_v40, %v3588_v46  ;;  %v3898_v24 = vadd.f32 %v3778_v4, %v3582_v43 }
 0x227   : > { %v3878_v53 = vpop.f32.mrb[30].mxu0  ;;  %2008 = vst [vmem:[%s3628_s6 + $0xe8] sm:$0xff] %v1908_v48  ;;  %v2812_v55 = vpop.eup %2811  ;;  %v1813_v13 = vadd.f32 1.0, %v2810_v25  ;;  %v1512_v58 = vmul.f32 0.5, %v3801_v8  ;;  %2825 = verf.f32 %v1621_v56  ;;  %v1620_v17 = vmul.f32 0.70710677, %v3885_v36 }
 0x228   : > { %v3887_v62 = vpop.f32.mrb[30].mxu1  ;;  %v3889_v51 = vpop.f32.mrb[31].mxu0  ;;  %v1911_v34 = vmul.f32 %v1811_v39, %v1511_v54  ;;  %2010 = vst [vmem:[%s3628_s6 + $0xf8] sm:$0xff] %v1910_v61  ;;  %v1812_v11 = vadd.f32 1.0, %v2812_v55  ;;  %v1514_v40 = vmul.f32 0.5, %v3805_v26  ;;  %v1515_v18 = vmul.f32 0.5, %v3825_v22 }
 0x229   : > { %v3900_v12 = vpop.f32.mrb[31].mxu1  ;;  %v2814_v50 = vpop.eup %2813  ;;  %v1622_v4 = vmul.f32 0.70710677, %v3894_v2  ;;  %v1913_v30 = vmul.f32 %v1813_v13, %v1513_v6  ;;  %2827 = verf.f32 %v1620_v17  ;;  %v1623_v8 = vmul.f32 0.70710677, %v3898_v24 }
 0x22a   : > { %2011 = vst [vmem:[%s3628_s6 + $0x100] sm:$0xff] %v1911_v34  ;;  %v1814_v27 = vadd.f32 1.0, %v2814_v50  ;;  %v1912_v16 = vmul.f32 %v1812_v11, %v1512_v58  ;;  %v3918_v26 = vadd.f32 %v3783_v15, %v3584_v44  ;;  %v3922_v22 = vadd.f32 %v3785_v1, %v3586_v45 }
 0x22b   : > { %v3909_v19 = vpop.f32.mrb[32].mxu0  ;;  %2829 = verf.f32 %v1622_v4  ;;  %v2816_v38 = vpop.eup %2815  ;;  %2013 = vst [vmem:[%s3628_s6 + $0x110] sm:$0xff] %v1913_v30  ;;  %v3929_v5 = vadd.f32 %v3790_v20, %v3588_v46  ;;  %v3933_v42 = vadd.f32 %v3807_v31, %v3582_v43  ;;  %v1517_v1 = vmul.f32 0.5, %v3829_v59 }
 0x22c   : > { %v3912_v0 = vpop.f32.mrb[32].mxu1  ;;  %v3914_v57 = vpop.f32.mrb[33].mxu0  ;;  %v1914_v10 = vmul.f32 %v1814_v27, %v1514_v40  ;;  %2831 = verf.f32 %v1623_v8  ;;  %2012 = vst [vmem:[%s3628_s6 + $0x108] sm:$0xff] %v1912_v16  ;;  %v1815_v14 = vadd.f32 1.0, %v2816_v38  ;;  %v1516_v54 = vmul.f32 0.5, %v3836_v52 }
 0x22d   : > { %v3924_v9 = vpop.f32.mrb[33].mxu1  ;;  %v2818_v15 = vpop.eup %2817  ;;  %v1625_v48 = vmul.f32 0.70710677, %v3918_v26  ;;  %v1518_v20 = vmul.f32 0.5, %v3854_v63  ;;  %v1624_v31 = vmul.f32 0.70710677, %v3922_v22  ;;  %v3960_v40 = vadd.f32 %v3812_v37, %v3586_v45 }
 0x22e   : > { %v2820_v49 = vpop.eup %2819  ;;  %2014 = vst [vmem:[%s3628_s6 + $0x118] sm:$0xff] %v1914_v10  ;;  %v1817_v61 = vadd.f32 1.0, %v2818_v15  ;;  %v1626_v6 = vmul.f32 0.70710677, %v3929_v5  ;;  %v1915_v25 = vmul.f32 %v1815_v14, %v1515_v18  ;;  %v1519_v59 = vmul.f32 0.5, %v3861_v28 }
 0x22f   : > { %v3939_v39 = vpop.f32.mrb[34].mxu0  ;;  %v2822_v56 = vpop.eup %2821  ;;  %v1816_v34 = vadd.f32 1.0, %v2820_v49  ;;  %2833 = verf.f32 %v1625_v48  ;;  %v1627_v63 = vmul.f32 0.70710677, %v3933_v42  ;;  %v3956_v28 = vadd.f32 %v3810_v35, %v3584_v44 }
 0x230   : > { %v3946_v52 = vpop.f32.mrb[34].mxu1  ;;  %v3948_v55 = vpop.f32.mrb[35].mxu0  ;;  %v1917_v13 = vmul.f32 %v1817_v61, %v1517_v1  ;;  %v1818_v58 = vadd.f32 1.0, %v2822_v56  ;;  %2835 = verf.f32 %v1624_v31  ;;  %2015 = vst [vmem:[%s3628_s6 + $0x120] sm:$0xff] %v1915_v25  ;;  %v3967_v8 = vadd.f32 %v3817_v47, %v3588_v46 }
 0x231   : > { %v3951_v17 = vpop.f32.mrb[35].mxu1  ;;  %v2824_v50 = vpop.eup %2823  ;;  %v1916_v11 = vmul.f32 %v1816_v34, %v1516_v54  ;;  %2837 = verf.f32 %v1626_v6  ;;  %v1521_v37 = vmul.f32 0.5, %v3865_v33  ;;  %v1520_v10 = vmul.f32 0.5, %v3885_v36 }
 0x232   : > { %v2826_v4 = vpop.eup %2825  ;;  %2017 = vst [vmem:[%s3628_s6 + $0x130] sm:$0xff] %v1917_v13  ;;  %v1918_v30 = vmul.f32 %v1818_v58, %v1518_v20  ;;  %v1819_v27 = vadd.f32 1.0, %v2824_v50  ;;  %2839 = verf.f32 %v1627_v63  ;;  %v1629_v15 = vmul.f32 0.70710677, %v3956_v28 }
 0x233   : > { %v3962_v18 = vpop.f32.mrb[36].mxu0  ;;  %2016 = vst [vmem:[%s3628_s6 + $0x128] sm:$0xff] %v1916_v11  ;;  %v1821_v38 = vadd.f32 1.0, %v2826_v4  ;;  %v2828_v1 = vpop.eup %2827  ;;  %v1522_v47 = vmul.f32 0.5, %v3894_v2  ;;  %v1628_v48 = vmul.f32 0.70710677, %v3960_v40  ;;  %v3985_v36 = vadd.f32 %v3831_v60, %v3582_v43 }
 0x234   : > { %v3969_v16 = vpop.f32.mrb[36].mxu1  ;;  %v3971_v35 = vpop.f32.mrb[37].mxu0  ;;  %2018 = vst [vmem:[%s3628_s6 + $0x138] sm:$0xff] %v1918_v30  ;;  %v1919_v54 = vmul.f32 %v1819_v27, %v1519_v59  ;;  %v1630_v49 = vmul.f32 0.70710677, %v3967_v8  ;;  %v1820_v20 = vadd.f32 1.0, %v2828_v1  ;;  %2841 = verf.f32 %v1629_v15 }
 0x235   : > { %v3977_v14 = vpop.f32.mrb[37].mxu1  ;;  %v2830_v61 = vpop.eup %2829  ;;  %v1921_v33 = vmul.f32 %v1821_v38, %v1521_v37  ;;  %2843 = verf.f32 %v1628_v48  ;;  %v3992_v2 = vadd.f32 %v3838_v3, %v3584_v44  ;;  %v3996_v25 = vadd.f32 %v3840_v23, %v3586_v45 }
 0x236   : > { %v2832_v6 = vpop.eup %2831  ;;  %2019 = vst [vmem:[%s3628_s6 + $0x140] sm:$0xff] %v1919_v54  ;;  %v1822_v56 = vadd.f32 1.0, %v2830_v61  ;;  %v1920_v60 = vmul.f32 %v1820_v20, %v1520_v10  ;;  %v1523_v13 = vmul.f32 0.5, %v3898_v24  ;;  %2845 = verf.f32 %v1630_v49 }
 0x237   : > { %v3987_v31 = vpop.f32.mrb[38].mxu0  ;;  %2021 = vst [vmem:[%s3628_s6 + $0x150] sm:$0xff] %v1921_v33  ;;  %v1823_v58 = vadd.f32 1.0, %v2832_v6  ;;  %v1525_v3 = vmul.f32 0.5, %v3918_v26  ;;  %v1631_v11 = vmul.f32 0.70710677, %v3985_v36  ;;  %v4014_v37 = vadd.f32 %v3843_v7, %v3588_v46 }
 0x238   : > { %v3998_v34 = vpop.f32.mrb[38].mxu1  ;;  %v4000_v59 = vpop.f32.mrb[39].mxu0  ;;  %v1922_v50 = vmul.f32 %v1822_v56, %v1522_v47  ;;  %v1633_v23 = vmul.f32 0.70710677, %v3992_v2  ;;  %2020 = vst [vmem:[%s3628_s6 + $0x148] sm:$0xff] %v1920_v60  ;;  %v1524_v27 = vmul.f32 0.5, %v3922_v22  ;;  %v4021_v15 = vadd.f32 %v3856_v21, %v3582_v43 }
 0x239   : > { %v4004_v63 = vpop.f32.mrb[39].mxu1  ;;  %v2834_v4 = vpop.eup %2833  ;;  %v1923_v30 = vmul.f32 %v1823_v58, %v1523_v13  ;;  %v1632_v24 = vmul.f32 0.70710677, %v3996_v25  ;;  %2847 = verf.f32 %v1631_v11  ;;  %v4025_v1 = vadd.f32 %v3867_v29, %v3584_v44 }
 0x23a   : > { %v2836_v10 = vpop.eup %2835  ;;  %2022 = vst [vmem:[%s3628_s6 + $0x158] sm:$0xff] %v1922_v50  ;;  %v1825_v26 = vadd.f32 1.0, %v2834_v4  ;;  %v1526_v48 = vmul.f32 0.5, %v3929_v5  ;;  %2849 = verf.f32 %v1633_v23  ;;  %v1634_v49 = vmul.f32 0.70710677, %v4014_v37 }
 0x23b   : > { %v4016_v38 = vpop.f32.mrb[40].mxu0  ;;  %v2838_v7 = vpop.eup %2837  ;;  %2023 = vst [vmem:[%s3628_s6 + $0x160] sm:$0xff] %v1923_v30  ;;  %v1824_v47 = vadd.f32 1.0, %v2836_v10  ;;  %v1527_v29 = vmul.f32 0.5, %v3933_v42  ;;  %2851 = verf.f32 %v1632_v24  ;;  %v1635_v60 = vmul.f32 0.70710677, %v4021_v15 }
 0x23c   : > { %v4027_v22 = vpop.f32.mrb[40].mxu1  ;;  %v4029_v54 = vpop.f32.mrb[41].mxu0  ;;  %v1925_v33 = vmul.f32 %v1825_v26, %v1525_v3  ;;  %v1826_v20 = vadd.f32 1.0, %v2838_v7  ;;  %2853 = verf.f32 %v1634_v49  ;;  %v1529_v58 = vmul.f32 0.5, %v3956_v28 }
 0x23d   : > { %v4034_v61 = vpop.f32.mrb[41].mxu1  ;;  %v2840_v21 = vpop.eup %2839  ;;  %v1924_v6 = vmul.f32 %v1824_v47, %v1524_v27  ;;  %v1637_v50 = vmul.f32 0.70710677, %v4025_v1  ;;  %v4045_v3 = vadd.f32 %v3869_v32, %v3586_v45  ;;  %2855 = verf.f32 %v1635_v60 }
 0x23e   : > { %v1827_v56 = vadd.f32 1.0, %v2840_v21  ;;  %2025 = vst [vmem:[%s3628_s6 + $0x170] sm:$0xff] %v1925_v33  ;;  %v1926_v5 = vmul.f32 %v1826_v20, %v1526_v48  ;;  %v2842_v23 = vpop.eup %2841  ;;  %v4054_v30 = vadd.f32 %v3874_v41, %v3588_v46  ;;  %v4058_v28 = vadd.f32 %v3878_v53, %v3582_v43 }
 0x23f   : > { %v4038_v13 = vpop.f32.mrb[42].mxu0  ;;  %2024 = vst [vmem:[%s3628_s6 + $0x168] sm:$0xff] %v1924_v6  ;;  %v2844_v32 = vpop.eup %2843  ;;  %v1829_v24 = vadd.f32 1.0, %v2842_v23  ;;  %v1528_v10 = vmul.f32 0.5, %v3960_v40  ;;  %2857 = verf.f32 %v1637_v50  ;;  %v1636_v26 = vmul.f32 0.70710677, %v4045_v3 }
 0x240   : > { %v4047_v42 = vpop.f32.mrb[42].mxu1  ;;  %v4049_v11 = vpop.f32.mrb[43].mxu0  ;;  %v1927_v4 = vmul.f32 %v1827_v56, %v1527_v29  ;;  %2026 = vst [vmem:[%s3628_s6 + $0x178] sm:$0xff] %v1926_v5  ;;  %v1828_v47 = vadd.f32 1.0, %v2844_v32  ;;  %v1530_v41 = vmul.f32 0.5, %v3967_v8  ;;  %v1531_v48 = vmul.f32 0.5, %v3985_v36 }
 0x241   : > { %v4060_v27 = vpop.f32.mrb[43].mxu1  ;;  %v2846_v7 = vpop.eup %2845  ;;  %v1638_v53 = vmul.f32 0.70710677, %v4054_v30  ;;  %v1929_v21 = vmul.f32 %v1829_v24, %v1529_v58  ;;  %2859 = verf.f32 %v1636_v26  ;;  %v1639_v40 = vmul.f32 0.70710677, %v4058_v28 }
 0x242   : > { %2027 = vst [vmem:[%s3628_s6 + $0x180] sm:$0xff] %v1927_v4  ;;  %v1830_v33 = vadd.f32 1.0, %v2846_v7  ;;  %v1928_v6 = vmul.f32 %v1828_v47, %v1528_v10  ;;  %v4078_v8 = vadd.f32 %v3887_v62, %v3584_v44  ;;  %v4082_v36 = vadd.f32 %v3889_v51, %v3586_v45 }
 0x243   : > { %v4069_v49 = vpop.f32.mrb[44].mxu0  ;;  %2861 = verf.f32 %v1638_v53  ;;  %v2848_v60 = vpop.eup %2847  ;;  %2029 = vst [vmem:[%s3628_s6 + $0x190] sm:$0xff] %v1929_v21  ;;  %v4089_v58 = vadd.f32 %v3900_v12, %v3588_v46  ;;  %v4093_v50 = vadd.f32 %v3909_v19, %v3582_v43  ;;  %v1533_v51 = vmul.f32 0.5, %v3992_v2 }
 0x244   : > { %v4072_v20 = vpop.f32.mrb[44].mxu1  ;;  %v4074_v29 = vpop.f32.mrb[45].mxu0  ;;  %v1930_v5 = vmul.f32 %v1830_v33, %v1530_v41  ;;  %2863 = verf.f32 %v1639_v40  ;;  %2028 = vst [vmem:[%s3628_s6 + $0x188] sm:$0xff] %v1928_v6  ;;  %v1831_v23 = vadd.f32 1.0, %v2848_v60  ;;  %v1532_v4 = vmul.f32 0.5, %v3996_v25 }
 0x245   : > { %v4084_v56 = vpop.f32.mrb[45].mxu1  ;;  %v2850_v62 = vpop.eup %2849  ;;  %v1641_v32 = vmul.f32 0.70710677, %v4078_v8  ;;  %v1534_v12 = vmul.f32 0.5, %v4014_v37  ;;  %v1640_v19 = vmul.f32 0.70710677, %v4082_v36 }
 0x246   : > { %v2852_v10 = vpop.eup %2851  ;;  %2030 = vst [vmem:[%s3628_s6 + $0x198] sm:$0xff] %v1930_v5  ;;  %v1833_v26 = vadd.f32 1.0, %v2850_v62  ;;  %v1642_v7 = vmul.f32 0.70710677, %v4089_v58  ;;  %v1931_v41 = vmul.f32 %v1831_v23, %v1531_v48  ;;  %v1535_v2 = vmul.f32 0.5, %v4021_v15 }
 0x247   : > { %v4099_v24 = vpop.f32.mrb[46].mxu0  ;;  %v2854_v47 = vpop.eup %2853  ;;  %v1832_v53 = vadd.f32 1.0, %v2852_v10  ;;  %2865 = verf.f32 %v1641_v32  ;;  %v1643_v37 = vmul.f32 0.70710677, %v4093_v50  ;;  %v4116_v15 = vadd.f32 %v3912_v0, %v3584_v44 }
 0x248   : > { %v4106_v25 = vpop.f32.mrb[46].mxu1  ;;  %v4108_v21 = vpop.f32.mrb[47].mxu0  ;;  %v1933_v33 = vmul.f32 %v1833_v26, %v1533_v51  ;;  %v1834_v40 = vadd.f32 1.0, %v2854_v47  ;;  %2867 = verf.f32 %v1640_v19  ;;  %2031 = vst [vmem:[%s3628_s6 + $0x1a0] sm:$0xff] %v1931_v41  ;;  %v4120_v5 = vadd.f32 %v3914_v57, %v3586_v45 }
 0x249   : > { %v4111_v6 = vpop.f32.mrb[47].mxu1  ;;  %v2856_v60 = vpop.eup %2855  ;;  %v1932_v48 = vmul.f32 %v1832_v53, %v1532_v4  ;;  %2869 = verf.f32 %v1642_v7  ;;  %v4127_v4 = vadd.f32 %v3924_v9, %v3588_v46  ;;  %v1537_v57 = vmul.f32 0.5, %v4025_v1 }
 0x24a   : > { %v2858_v23 = vpop.eup %2857  ;;  %2033 = vst [vmem:[%s3628_s6 + $0x1b0] sm:$0xff] %v1933_v33  ;;  %v1934_v51 = vmul.f32 %v1834_v40, %v1534_v12  ;;  %v1835_v32 = vadd.f32 1.0, %v2856_v60  ;;  %2871 = verf.f32 %v1643_v37  ;;  %v1536_v19 = vmul.f32 0.5, %v4045_v3 }
 0x24b   : > { %v4122_v62 = vpop.f32.mrb[48].mxu0  ;;  %2032 = vst [vmem:[%s3628_s6 + $0x1a8] sm:$0xff] %v1932_v48  ;;  %v1837_v26 = vadd.f32 1.0, %v2858_v23  ;;  %v1645_v7 = vmul.f32 0.70710677, %v4116_v15  ;;  %v2860_v47 = vpop.eup %2859  ;;  %v1538_v41 = vmul.f32 0.5, %v4054_v30  ;;  %v4145_v3 = vadd.f32 %v3939_v39, %v3582_v43 }
 0x24c   : > { %v4129_v10 = vpop.f32.mrb[48].mxu1  ;;  %v4131_v0 = vpop.f32.mrb[49].mxu0  ;;  %2034 = vst [vmem:[%s3628_s6 + $0x1b8] sm:$0xff] %v1934_v51  ;;  %v1935_v9 = vmul.f32 %v1835_v32, %v1535_v2  ;;  %v1644_v53 = vmul.f32 0.70710677, %v4120_v5  ;;  %v1836_v37 = vadd.f32 1.0, %v2860_v47  ;;  %v4150_v30 = vadd.f32 %v3946_v52, %v3584_v44 }
 0x24d   : > { %v4137_v12 = vpop.f32.mrb[49].mxu1  ;;  %v1646_v33 = vmul.f32 0.70710677, %v4127_v4  ;;  %v2862_v40 = vpop.eup %2861  ;;  %v1937_v1 = vmul.f32 %v1837_v26, %v1537_v57  ;;  %2873 = verf.f32 %v1645_v7  ;;  %v4154_v2 = vadd.f32 %v3948_v55, %v3586_v45 }
 0x24e   : > { %v2864_v60 = vpop.eup %2863  ;;  %2035 = vst [vmem:[%s3628_s6 + $0x1c0] sm:$0xff] %v1935_v9  ;;  %v1838_v48 = vadd.f32 1.0, %v2862_v40  ;;  %2875 = verf.f32 %v1644_v53  ;;  %v1936_v23 = vmul.f32 %v1836_v37, %v1536_v19  ;;  %v1539_v51 = vmul.f32 0.5, %v4058_v28 }
 0x24f   : > { %2037 = vst [vmem:[%s3628_s6 + $0x1d0] sm:$0xff] %v1937_v1  ;;  %v1839_v39 = vadd.f32 1.0, %v2864_v60  ;;  %2877 = verf.f32 %v1646_v33  ;;  %v1541_v57 = vmul.f32 0.5, %v4078_v8  ;;  %v1647_v26 = vmul.f32 0.70710677, %v4145_v3 }
 0x250   : > { %v1938_v32 = vmul.f32 %v1838_v48, %v1538_v41  ;;  %v1649_v52 = vmul.f32 0.70710677, %v4150_v30  ;;  %2036 = vst [vmem:[%s3628_s6 + $0x1c8] sm:$0xff] %v1936_v23  ;;  %v1540_v55 = vmul.f32 0.5, %v4082_v36  ;;  %v1648_v9 = vmul.f32 0.70710677, %v4154_v2 }
 0x251   : > { %v2866_v7 = vpop.eup %2865  ;;  %v1939_v47 = vmul.f32 %v1839_v39, %v1539_v51  ;;  %v4166_v28 = vadd.f32 %v3951_v17, %v3588_v46  ;;  %2879 = verf.f32 %v1647_v26  ;;  %v4171_v8 = vadd.f32 %v3962_v18, %v3582_v43 }
 0x252   : > { %v2868_v19 = vpop.eup %2867  ;;  %2038 = vst [vmem:[%s3628_s6 + $0x1d8] sm:$0xff] %v1938_v32  ;;  %v1841_v41 = vadd.f32 1.0, %v2866_v7  ;;  %v4175_v53 = vadd.f32 %v3969_v16, %v3584_v44  ;;  %v1542_v40 = vmul.f32 0.5, %v4089_v58  ;;  %2881 = verf.f32 %v1649_v52 }
 0x253   : > { %v2870_v36 = vpop.eup %2869  ;;  %2039 = vst [vmem:[%s3628_s6 + $0x1e0] sm:$0xff] %v1939_v47  ;;  %v1840_v33 = vadd.f32 1.0, %v2868_v19  ;;  %v1650_v17 = vmul.f32 0.70710677, %v4166_v28  ;;  %v1543_v18 = vmul.f32 0.5, %v4093_v50  ;;  %2883 = verf.f32 %v1648_v9 }
 0x254   : > { %v2872_v1 = vpop.eup %2871  ;;  %v1941_v37 = vmul.f32 %v1841_v41, %v1541_v57  ;;  %v1842_v60 = vadd.f32 1.0, %v2870_v36  ;;  %v1651_v23 = vmul.f32 0.70710677, %v4171_v8  ;;  %v1545_v58 = vmul.f32 0.5, %v4116_v15 }
 0x255   : > { %v1940_v48 = vmul.f32 %v1840_v33, %v1540_v55  ;;  %v1843_v16 = vadd.f32 1.0, %v2872_v1  ;;  %2885 = verf.f32 %v1650_v17  ;;  %v1653_v39 = vmul.f32 0.70710677, %v4175_v53 }
 0x256   : > { %2041 = vst [vmem:[%s3628_s6 + $0x1f0] sm:$0xff] %v1941_v37  ;;  %v1942_v51 = vmul.f32 %v1842_v60, %v1542_v40  ;;  %v4187_v32 = vadd.f32 %v3971_v35, %v3586_v45  ;;  %2887 = verf.f32 %v1651_v23  ;;  %v4192_v26 = vadd.f32 %v3977_v14, %v3588_v46 }
 0x257   : > { %v2874_v57 = vpop.eup %2873  ;;  %2040 = vst [vmem:[%s3628_s6 + $0x1e8] sm:$0xff] %v1940_v48  ;;  %v1943_v50 = vmul.f32 %v1843_v16, %v1543_v18  ;;  %v4196_v52 = vadd.f32 %v3987_v31, %v3582_v43  ;;  %v1544_v47 = vmul.f32 0.5, %v4120_v5  ;;  %2889 = verf.f32 %v1653_v39 }
 0x258   : > { %v2876_v15 = vpop.eup %2875  ;;  %2042 = vst [vmem:[%s3628_s6 + $0x1f8] sm:$0xff] %v1942_v51  ;;  %v1845_v7 = vadd.f32 1.0, %v2874_v57  ;;  %v1652_v35 = vmul.f32 0.70710677, %v4187_v32  ;;  %v1546_v19 = vmul.f32 0.5, %v4127_v4  ;;  %v1547_v14 = vmul.f32 0.5, %v4145_v3 }
 0x259   : > { %v2878_v55 = vpop.eup %2877  ;;  %2043 = vst [vmem:[%s3628_s6 + $0x200] sm:$0xff] %v1943_v50  ;;  %v1844_v9 = vadd.f32 1.0, %v2876_v15  ;;  %v1654_v41 = vmul.f32 0.70710677, %v4192_v26  ;;  %v1655_v33 = vmul.f32 0.70710677, %v4196_v52  ;;  %v4208_v40 = vadd.f32 %v3998_v34, %v3584_v44 }
 0x25a   : > { %v1945_v31 = vmul.f32 %v1845_v7, %v1545_v58  ;;  %v1846_v36 = vadd.f32 1.0, %v2878_v55  ;;  %2891 = verf.f32 %v1652_v35  ;;  %v4212_v4 = vadd.f32 %v4000_v59, %v3586_v45 }
 0x25b   : > { %v1944_v5 = vmul.f32 %v1844_v9, %v1544_v47  ;;  %2893 = verf.f32 %v1654_v41  ;;  %v2880_v3 = vpop.eup %2879  ;;  %v4217_v1 = vadd.f32 %v4004_v63, %v3588_v46  ;;  %v4221_v37 = vadd.f32 %v4016_v38, %v3582_v43 }
 0x25c   : > { %2045 = vst [vmem:[%s3628_s6 + $0x210] sm:$0xff] %v1945_v31  ;;  %v1946_v17 = vmul.f32 %v1846_v36, %v1546_v19  ;;  %2895 = verf.f32 %v1655_v33  ;;  %v2882_v60 = vpop.eup %2881  ;;  %v1847_v34 = vadd.f32 1.0, %v2880_v3  ;;  %v1549_v18 = vmul.f32 0.5, %v4150_v30 }
 0x25d   : > { %2044 = vst [vmem:[%s3628_s6 + $0x208] sm:$0xff] %v1944_v5  ;;  %v1548_v59 = vmul.f32 0.5, %v4154_v2  ;;  %v1657_v48 = vmul.f32 0.70710677, %v4208_v40  ;;  %v2884_v16 = vpop.eup %2883  ;;  %v1849_v23 = vadd.f32 1.0, %v2882_v60  ;;  %v1550_v63 = vmul.f32 0.5, %v4166_v28 }
 0x25e   : > { %2046 = vst [vmem:[%s3628_s6 + $0x218] sm:$0xff] %v1946_v17  ;;  %v1656_v51 = vmul.f32 0.70710677, %v4212_v4  ;;  %v1658_v38 = vmul.f32 0.70710677, %v4217_v1  ;;  %v1947_v39 = vmul.f32 %v1847_v34, %v1547_v14  ;;  %v1848_v57 = vadd.f32 1.0, %v2884_v16 }
 0x25f   : > { %v2886_v58 = vpop.eup %2885  ;;  %v1551_v30 = vmul.f32 0.5, %v4171_v8  ;;  %2897 = verf.f32 %v1657_v48  ;;  %v1949_v2 = vmul.f32 %v1849_v23, %v1549_v18  ;;  %v1659_v15 = vmul.f32 0.70710677, %v4221_v37 }
 0x260   : > { %v1850_v50 = vadd.f32 1.0, %v2886_v58  ;;  %2899 = verf.f32 %v1656_v51  ;;  %v2888_v7 = vpop.eup %2887  ;;  %2047 = vst [vmem:[%s3628_s6 + $0x220] sm:$0xff] %v1947_v39  ;;  %v1948_v28 = vmul.f32 %v1848_v57, %v1548_v59  ;;  %v4236_v47 = vadd.f32 %v4027_v22, %v3584_v44 }
 0x261   : > { %2901 = verf.f32 %v1658_v38  ;;  %v4240_v35 = vadd.f32 %v4029_v54, %v3586_v45  ;;  %v2890_v8 = vpop.eup %2889  ;;  %2049 = vst [vmem:[%s3628_s6 + $0x230] sm:$0xff] %v1949_v2  ;;  %v1851_v9 = vadd.f32 1.0, %v2888_v7  ;;  %v4245_v19 = vadd.f32 %v4034_v61, %v3588_v46 }
 0x262   : > { %v1950_v55 = vmul.f32 %v1850_v50, %v1550_v63  ;;  %2903 = verf.f32 %v1659_v15  ;;  %2048 = vst [vmem:[%s3628_s6 + $0x228] sm:$0xff] %v1948_v28  ;;  %v1553_v14 = vmul.f32 0.5, %v4175_v53  ;;  %v1853_v41 = vadd.f32 1.0, %v2890_v8 }
 0x263   : > { %v1552_v22 = vmul.f32 0.5, %v4187_v32  ;;  %v1661_v31 = vmul.f32 0.70710677, %v4236_v47  ;;  %v1951_v36 = vmul.f32 %v1851_v9, %v1551_v30  ;;  %v1554_v33 = vmul.f32 0.5, %v4192_v26 }
 0x264   : > { %v2892_v54 = vpop.eup %2891  ;;  %2050 = vst [vmem:[%s3628_s6 + $0x238] sm:$0xff] %v1950_v55  ;;  %v1660_v5 = vmul.f32 0.70710677, %v4240_v35  ;;  %v1662_v61 = vmul.f32 0.70710677, %v4245_v19  ;;  %v1953_v17 = vmul.f32 %v1853_v41, %v1553_v14  ;;  %v4257_v53 = vadd.f32 %v4038_v13, %v3582_v43 }
 0x265   : > { %v2894_v3 = vpop.eup %2893  ;;  %v1852_v60 = vadd.f32 1.0, %v2892_v54  ;;  %2905 = verf.f32 %v1661_v31  ;;  %2051 = vst [vmem:[%s3628_s6 + $0x240] sm:$0xff] %v1951_v36  ;;  %v4262_v26 = vadd.f32 %v4047_v42, %v3584_v44  ;;  %v4266_v18 = vadd.f32 %v4049_v11, %v3586_v45 }
 0x266   : > { %v2896_v32 = vpop.eup %2895  ;;  %v1854_v34 = vadd.f32 1.0, %v2894_v3  ;;  %2907 = verf.f32 %v1660_v5  ;;  %2053 = vst [vmem:[%s3628_s6 + $0x250] sm:$0xff] %v1953_v17  ;;  %v1555_v48 = vmul.f32 0.5, %v4196_v52  ;;  %v1557_v23 = vmul.f32 0.5, %v4208_v40 }
 0x267   : > { %v1952_v59 = vmul.f32 %v1852_v60, %v1552_v22  ;;  %v1855_v13 = vadd.f32 1.0, %v2896_v32  ;;  %2909 = verf.f32 %v1662_v61  ;;  %v1663_v63 = vmul.f32 0.70710677, %v4257_v53 }
 0x268   : > { %v1954_v16 = vmul.f32 %v1854_v34, %v1554_v33  ;;  %v1665_v42 = vmul.f32 0.70710677, %v4262_v26  ;;  %v1556_v11 = vmul.f32 0.5, %v4212_v4  ;;  %v1664_v58 = vmul.f32 0.70710677, %v4266_v18 }
 0x269   : > { %v2898_v51 = vpop.eup %2897  ;;  %2052 = vst [vmem:[%s3628_s6 + $0x248] sm:$0xff] %v1952_v59  ;;  %v1955_v38 = vmul.f32 %v1855_v13, %v1555_v48  ;;  %v4278_v52 = vadd.f32 %v4060_v27, %v3588_v46  ;;  %2911 = verf.f32 %v1663_v63  ;;  %v4283_v40 = vadd.f32 %v4069_v49, %v3582_v43 }
 0x26a   : > { %v2900_v39 = vpop.eup %2899  ;;  %2054 = vst [vmem:[%s3628_s6 + $0x258] sm:$0xff] %v1954_v16  ;;  %v1857_v57 = vadd.f32 1.0, %v2898_v51  ;;  %v4287_v30 = vadd.f32 %v4072_v20, %v3584_v44  ;;  %v1558_v50 = vmul.f32 0.5, %v4217_v1  ;;  %2913 = verf.f32 %v1665_v42 }
 0x26b   : > { %v2902_v4 = vpop.eup %2901  ;;  %2055 = vst [vmem:[%s3628_s6 + $0x260] sm:$0xff] %v1955_v38  ;;  %v1856_v2 = vadd.f32 1.0, %v2900_v39  ;;  %v1666_v27 = vmul.f32 0.70710677, %v4278_v52  ;;  %v1559_v49 = vmul.f32 0.5, %v4221_v37  ;;  %2915 = verf.f32 %v1664_v58 }
 0x26c   : > { %v2904_v15 = vpop.eup %2903  ;;  %v1957_v7 = vmul.f32 %v1857_v57, %v1557_v23  ;;  %v1858_v28 = vadd.f32 1.0, %v2902_v4  ;;  %v1667_v55 = vmul.f32 0.70710677, %v4283_v40  ;;  %v1561_v1 = vmul.f32 0.5, %v4236_v47 }
 0x26d   : > { %v1956_v8 = vmul.f32 %v1856_v2, %v1556_v11  ;;  %v1859_v20 = vadd.f32 1.0, %v2904_v15  ;;  %2917 = verf.f32 %v1666_v27  ;;  %v1669_v14 = vmul.f32 0.70710677, %v4287_v30 }
 0x26e   : > { %2057 = vst [vmem:[%s3628_s6 + $0x270] sm:$0xff] %v1957_v7  ;;  %v1958_v9 = vmul.f32 %v1858_v28, %v1558_v50  ;;  %v4299_v41 = vadd.f32 %v4074_v29, %v3586_v45  ;;  %2919 = verf.f32 %v1667_v55  ;;  %v4304_v31 = vadd.f32 %v4084_v56, %v3588_v46 }
 0x26f   : > { %v2906_v22 = vpop.eup %2905  ;;  %2056 = vst [vmem:[%s3628_s6 + $0x268] sm:$0xff] %v1956_v8  ;;  %v1959_v37 = vmul.f32 %v1859_v20, %v1559_v49  ;;  %v4308_v54 = vadd.f32 %v4099_v24, %v3582_v43  ;;  %v1560_v33 = vmul.f32 0.5, %v4240_v35  ;;  %2921 = verf.f32 %v1669_v14 }
 0x270   : > { %v2908_v47 = vpop.eup %2907  ;;  %2058 = vst [vmem:[%s3628_s6 + $0x278] sm:$0xff] %v1958_v9  ;;  %v1861_v36 = vadd.f32 1.0, %v2906_v22  ;;  %v1668_v29 = vmul.f32 0.70710677, %v4299_v41  ;;  %v1562_v3 = vmul.f32 0.5, %v4245_v19  ;;  %v1563_v56 = vmul.f32 0.5, %v4257_v53 }
 0x271   : > { %v2910_v5 = vpop.eup %2909  ;;  %2059 = vst [vmem:[%s3628_s6 + $0x280] sm:$0xff] %v1959_v37  ;;  %v1860_v61 = vadd.f32 1.0, %v2908_v47  ;;  %v1670_v17 = vmul.f32 0.70710677, %v4304_v31  ;;  %v1671_v32 = vmul.f32 0.70710677, %v4308_v54  ;;  %v4320_v34 = vadd.f32 %v4106_v25, %v3584_v44 }
 0x272   : > { %v1961_v24 = vmul.f32 %v1861_v36, %v1561_v1  ;;  %v1862_v60 = vadd.f32 1.0, %v2910_v5  ;;  %2923 = verf.f32 %v1668_v29  ;;  %v4324_v19 = vadd.f32 %v4108_v21, %v3586_v45 }
 0x273   : > { %v1960_v35 = vmul.f32 %v1860_v61, %v1560_v33  ;;  %2925 = verf.f32 %v1670_v17  ;;  %v2912_v53 = vpop.eup %2911  ;;  %v4329_v48 = vadd.f32 %v4111_v6, %v3588_v46  ;;  %v4333_v13 = vadd.f32 %v4122_v62, %v3582_v43 }
 0x274   : > { %2061 = vst [vmem:[%s3628_s6 + $0x290] sm:$0xff] %v1961_v24  ;;  %v1962_v59 = vmul.f32 %v1862_v60, %v1562_v3  ;;  %2927 = verf.f32 %v1671_v32  ;;  %v2914_v16 = vpop.eup %2913  ;;  %v1863_v25 = vadd.f32 1.0, %v2912_v53  ;;  %v1565_v23 = vmul.f32 0.5, %v4262_v26 }
 0x275   : > { %2060 = vst [vmem:[%s3628_s6 + $0x288] sm:$0xff] %v1960_v35  ;;  %v1564_v21 = vmul.f32 0.5, %v4266_v18  ;;  %v1673_v63 = vmul.f32 0.70710677, %v4320_v34  ;;  %v2916_v42 = vpop.eup %2915  ;;  %v1865_v51 = vadd.f32 1.0, %v2914_v16  ;;  %v1566_v6 = vmul.f32 0.5, %v4278_v52 }
 0x276   : > { %2062 = vst [vmem:[%s3628_s6 + $0x298] sm:$0xff] %v1962_v59  ;;  %v1672_v38 = vmul.f32 0.70710677, %v4324_v19  ;;  %v1674_v43 = vmul.f32 0.70710677, %v4329_v48  ;;  %v1963_v11 = vmul.f32 %v1863_v25, %v1563_v56  ;;  %v1864_v58 = vadd.f32 1.0, %v2916_v42 }
 0x277   : > { %v2918_v62 = vpop.eup %2917  ;;  %v1567_v26 = vmul.f32 0.5, %v4283_v40  ;;  %2929 = verf.f32 %v1673_v63  ;;  %v1965_v18 = vmul.f32 %v1865_v51, %v1565_v23  ;;  %v1675_v57 = vmul.f32 0.70710677, %v4333_v13 }
 0x278   : > { %v1866_v39 = vadd.f32 1.0, %v2918_v62  ;;  %2931 = verf.f32 %v1672_v38  ;;  %v2920_v4 = vpop.eup %2919  ;;  %2063 = vst [vmem:[%s3628_s6 + $0x2a0] sm:$0xff] %v1963_v11  ;;  %v1964_v52 = vmul.f32 %v1864_v58, %v1564_v21  ;;  %v2573_v2 = vadd.f32 %v4129_v10, %v3584_v44 }
 0x279   : > { %2933 = verf.f32 %v1674_v43  ;;  %v2524_v50 = vadd.f32 %v4131_v0, %v3586_v45  ;;  %v2922_v27 = vpop.eup %2921  ;;  %2065 = vst [vmem:[%s3628_s6 + $0x2b0] sm:$0xff] %v1965_v18  ;;  %v1867_v15 = vadd.f32 1.0, %v2920_v4  ;;  %v2574_v7 = vadd.f32 %v4137_v12, %v3588_v46 }
 0x27a   : > { %v1966_v40 = vmul.f32 %v1866_v39, %v1566_v6  ;;  %2935 = verf.f32 %v1675_v57  ;;  %2064 = vst [vmem:[%s3628_s6 + $0x2a8] sm:$0xff] %v1964_v52  ;;  %v1569_v28 = vmul.f32 0.5, %v4287_v30  ;;  %v1869_v49 = vadd.f32 1.0, %v2922_v27 }
 0x27b   : > { %v1677_v8 = vmul.f32 0.70710677, %v2573_v2  ;;  %v1967_v44 = vmul.f32 %v1867_v15, %v1567_v26  ;;  %v1676_v10 = vmul.f32 0.70710677, %v2524_v50  ;;  %v1678_v45 = vmul.f32 0.70710677, %v2574_v7 }
 0x27c   : > { %v2924_v20 = vpop.eup %2923  ;;  %2066 = vst [vmem:[%s3628_s6 + $0x2b8] sm:$0xff] %v1966_v40  ;;  %v1969_v55 = vmul.f32 %v1869_v49, %v1569_v28  ;;  %v1568_v9 = vmul.f32 0.5, %v4299_v41  ;;  %v1570_v12 = vmul.f32 0.5, %v4304_v31  ;;  %v1571_v22 = vmul.f32 0.5, %v4308_v54 }
 0x27d   : > { %v2926_v0 = vpop.eup %2925  ;;  %v1868_v1 = vadd.f32 1.0, %v2924_v20  ;;  %2937 = verf.f32 %v1677_v8  ;;  %2067 = vst [vmem:[%s3628_s6 + $0x2c0] sm:$0xff] %v1967_v44  ;;  %v1573_v29 = vmul.f32 0.5, %v4320_v34  ;;  %v1572_v61 = vmul.f32 0.5, %v4324_v19 }
 0x27e   : > { %v2928_v46 = vpop.eup %2927  ;;  %v1870_v30 = vadd.f32 1.0, %v2926_v0  ;;  %2939 = verf.f32 %v1676_v10  ;;  %2069 = vst [vmem:[%s3628_s6 + $0x2d0] sm:$0xff] %v1969_v55  ;;  %v1574_v17 = vmul.f32 0.5, %v4329_v48  ;;  %v1575_v32 = vmul.f32 0.5, %v4333_v13 }
 0x27f   : > { %v1968_v14 = vmul.f32 %v1868_v1, %v1568_v9  ;;  %v1871_v37 = vadd.f32 1.0, %v2928_v46  ;;  %2941 = verf.f32 %v1678_v45  ;;  %v1577_v16 = vmul.f32 0.5, %v2573_v2 }
 0x280   : > { %v1970_v47 = vmul.f32 %v1870_v30, %v1570_v12  ;;  %v1576_v13 = vmul.f32 0.5, %v2524_v50  ;;  %v1578_v63 = vmul.f32 0.5, %v2574_v7 }
 0x281   : > { %v2930_v36 = vpop.eup %2929  ;;  %2068 = vst [vmem:[%s3628_s6 + $0x2c8] sm:$0xff] %v1968_v14  ;;  %v1971_v41 = vmul.f32 %v1871_v37, %v1571_v22 }
 0x282   : > { %v2932_v33 = vpop.eup %2931  ;;  %2070 = vst [vmem:[%s3628_s6 + $0x2d8] sm:$0xff] %v1970_v47  ;;  %v1873_v31 = vadd.f32 1.0, %v2930_v36 }
 0x283   : > { %v2934_v5 = vpop.eup %2933  ;;  %2071 = vst [vmem:[%s3628_s6 + $0x2e0] sm:$0xff] %v1971_v41  ;;  %v1872_v54 = vadd.f32 1.0, %v2932_v33 }
 0x284   : > { %v2936_v3 = vpop.eup %2935  ;;  %v1973_v56 = vmul.f32 %v1873_v31, %v1573_v29  ;;  %v1874_v24 = vadd.f32 1.0, %v2934_v5 }
 0x285   : > { %v1972_v60 = vmul.f32 %v1872_v54, %v1572_v61  ;;  %v1875_v35 = vadd.f32 1.0, %v2936_v3 }
 0x286   : > { %2073 = vst [vmem:[%s3628_s6 + $0x2f0] sm:$0xff] %v1973_v56  ;;  %v1974_v34 = vmul.f32 %v1874_v24, %v1574_v17 }
 0x287   : > { %v2938_v53 = vpop.eup %2937  ;;  %2072 = vst [vmem:[%s3628_s6 + $0x2e8] sm:$0xff] %v1972_v60  ;;  %v1975_v59 = vmul.f32 %v1875_v35, %v1575_v32 }
 0x288   : > { %v2940_v19 = vpop.eup %2939  ;;  %2074 = vst [vmem:[%s3628_s6 + $0x2f8] sm:$0xff] %v1974_v34  ;;  %v1877_v25 = vadd.f32 1.0, %v2938_v53 }
 0x289   : > { %v2942_v48 = vpop.eup %2941  ;;  %2075 = vst [vmem:[%s3628_s6 + $0x300] sm:$0xf] %v1975_v59  ;;  %v1876_v23 = vadd.f32 1.0, %v2940_v19 }
 0x28a   : > { %v1977_v21 = vmul.f32 %v1877_v25, %v1577_v16  ;;  %v1878_v42 = vadd.f32 1.0, %v2942_v48 }
 0x28b   : > { %v1976_v51 = vmul.f32 %v1876_v23, %v1576_v13 }
 0x28c   : > { %2077 = vst [vmem:[%s3628_s6 + $0x310] sm:$0xf] %v1977_v21  ;;  %v1978_v6 = vmul.f32 %v1878_v42, %v1578_v63 }
 0x28d   : > { %2076 = vst [vmem:[%s3628_s6 + $0x308] sm:$0xf] %v1976_v51 }
 0x28e   : > { %2078 = vst [vmem:[%s3628_s6 + $0x318] sm:$0xf] %v1978_v6 }
 0x28f   : > { %3044 = shalt.err (!%p3041_p1)
}
 0x290   : > { %s3045_s11 = scalar_lea.hbm %s4377_s23, 12800  ;;  %s3049_s18 = scalar_lea.hbm %s4428_s3, 51200 }
 0x291   : > { %p3046_p4 = scmp.ne.s32.totalorder %s4377_s23, %s3045_s11  ;;  %p3050_p3 = scmp.lt.u32.totalorder %s4377_s23, %s4428_s3 }
 0x292   : > { %p3051_p6 = scmp.lt.u32.totalorder %s3049_s18, %s3045_s11  ;;  %p3053_p8 = scmp.lt.u32.totalorder %s3045_s11, %s4377_s23 }
 0x293   : > { %p3047_p10 = pnand %p3046_p4, %p4447_p11 }
 0x294   : > { %p3052_p13 = por %p3051_p6, %p3050_p3 }
 0x295   : > { %p3048_p7 = pneg %p3047_p10 }
 0x296   : > { %p3054_p12 = por %p3053_p8, %p3052_p13 }
 0x298   : > { %p3055_p5 = pnand %p3054_p12, %p3048_p7 }
 0x29a   : > { %3058 = shalt.err (!%p3055_p5)
}
 0x29b   : > { %s3109_s4 = smov 512   ;;  %s3110_s6 = smov 2048  }
 0x29c   : > { %s3111_s7 = smov 32  }
 0x29d   : > { %2684 = dma.vmem_to_hbm [thread:$0]  (%p4447_p11), %s4379_s8, 12800, %s4377_s23, %s2080_s21, %s3109_s4, %s3110_s6, %s3111_s7  }
 0x29e PF: > { %p2704_p2 = scmp.ge.s32.totalorder %s3101_s15, 2  ;;  %s2108_s9 = sand.u32 1, %s3089_s12  }
 0x29f   : > { %p4448_p0 = scmp.ne.s32.totalorder %s4438_s27, 0  ;;  %s2109_s28 = scalar_lea.sflag [#allocation4], %s2108_s9 }
 0x2a1   : > { %p2698_p9 = pnand %p2704_p2, %p4448_p0 }
 0x2a3   : > { %3084 = dma.done.wait (!%p2698_p9), %s2109_s28, 12800  }
 0x2a4   : > { %3086 = vsyncadd (!%p2698_p9), %s2109_s28, 4294954496  ;;  %p17_p1 = scmp.ge.s32.totalorder %s3153_s16, 6   ;;  %s4449_s12 = smov %s3093_s13 }
 0x2a5   : > { %s4450_s13 = smov %s3097_s14  ;;  %s4451_s14 = smov %s3162_s19 }
 0x2a6   : > { %s4452_s15 = smov %s3153_s16  ;;  %19 = sbr.rel (!%p17_p1) target bundleno = 6 (0x6), region = 93 }
 0x2ad   :  { %2114 = vsyncpa [#allocation3], 1 }
 0x2ae   :  { %2116 = vsyncpa [#allocation3 + $0x1], 1 }
 0x2af   :  { %2117 = vsyncpa [#allocation6], 1 }
 0x2b0   :  { %2119 = vsyncpa [#allocation6 + $0x1], 1 }
 0x2b1   :  { %2120 = vsyncpa [#allocation4], 1 }
 0x2b2   :  { %2122 = vsyncpa [#allocation4 + $0x1], 1 }

</bundles_post_ra>
